<compile_context>
chip_gen: v5e
topology: v5e:2x2
jax: 0.10.0
libtpu: 0.0.40
codegen_flags: <defaults>
</compile_context>

<pallas_src>
import jax
import jax.numpy as jnp
from jax.experimental import pallas as pl
from jax.experimental.pallas import tpu as pltpu

IN_DIM = 28 * 28                      # 784
H1, H2, OUT_DIM = 400, 200, 10
# Lane / MXU friendly padded sizes.
H1_PAD, H2_PAD, OUT_PAD = 512, 256, 128


def _round_up(n, m):
    return ((n + m - 1) // m) * m


def _pad2(a, rows, cols):
    r, c = a.shape
    return jnp.pad(a, ((0, rows - r), (0, cols - c)))


# -----------------------------------------------------------------------------
# Kernel: whole MLP fused; intermediates never leave VMEM.
# -----------------------------------------------------------------------------
def mlp_kernel(x_ref, w1_ref, b1_ref, w2_ref, b2_ref, w3_ref, b3_ref, o_ref):
    cd = w1_ref.dtype                      # compute dtype (f32 or bf16)
    # Layer 1: Linear(784 -> 512pad) + ReLU   (f32 MXU accumulation)
    h1 = jnp.dot(x_ref[...], w1_ref[...], preferred_element_type=jnp.float32)
    h1 = jnp.maximum(h1 + b1_ref[...], 0.0)
    # Layer 2: Linear(512pad -> 256pad) + ReLU
    h2 = jnp.dot(h1.astype(cd), w2_ref[...], preferred_element_type=jnp.float32)
    h2 = jnp.maximum(h2 + b2_ref[...], 0.0)
    # Layer 3: Linear(256pad -> 128pad), no activation; lane-dense store.
    out = jnp.dot(h2.astype(cd), w3_ref[...], preferred_element_type=jnp.float32)
    o_ref[...] = (out + b3_ref[...]).astype(o_ref.dtype)


# -----------------------------------------------------------------------------
# One-time capability probe for single-buffered (pl.Buffered(1)) blocks.
# -----------------------------------------------------------------------------
_SINGLE_BUFFER_OK = None


def _single_buffer_supported():
    """Probe pl.Buffered(1) once (eagerly) and cache the result.

    This replaces the previous blanket try/except around the production
    pallas_call, which could escape under an outer jit and silently doubled
    weight VMEM on unrelated errors.
    """
    global _SINGLE_BUFFER_OK
    if _SINGLE_BUFFER_OK is not None:
        return _SINGLE_BUFFER_OK
    try:
        def _probe(a_ref, w_ref, b_ref, o_ref):
            o_ref[...] = a_ref[...] + w_ref[...] + b_ref[...]

        f = pl.pallas_call(
            _probe,
            out_shape=jax.ShapeDtypeStruct((16, 128), jnp.float32),
            grid_spec=pltpu.PrefetchScalarGridSpec(
                num_scalar_prefetch=0,
                grid=(2,),
                in_specs=[
                    pl.BlockSpec((8, 128), lambda i: (i, 0)),
                    pl.BlockSpec((8, 128), lambda i: (0, 0),
                                 pipeline_mode=pl.Buffered(1)),
                    pl.BlockSpec((1, 128), lambda i: (0, 0),
                                 pipeline_mode=pl.Buffered(1)),
                ],
                out_specs=pl.BlockSpec((8, 128), lambda i: (i, 0)),
            ),
        )
        jax.block_until_ready(
            f(jnp.zeros((16, 128), jnp.float32),
              jnp.zeros((8, 128), jnp.float32),
              jnp.zeros((1, 128), jnp.float32)))
        _SINGLE_BUFFER_OK = True
    except Exception:                      # capability probe only
        _SINGLE_BUFFER_OK = False
    return _SINGLE_BUFFER_OK


# -----------------------------------------------------------------------------
# One-time parameter preparation (hoisted out of the forward pass).
# -----------------------------------------------------------------------------
def prepare_params(params, compute_dtype=jnp.bfloat16):
    """Zero-pad weights to lane/MXU-friendly sizes and cast to compute dtype.

    Call this ONCE and reuse the result across forward calls; re-padding and
    re-casting ~2.3 MB of weights per call adds HBM traffic comparable to the
    x stream for small/medium batches.  Weights are stored (in, out) so the
    kernel computes y = x @ W + b.  Biases stay f32 (bias add happens on the
    f32 accumulator).  The zero padding is numerically inert through ReLU.
    """
    w1, b1, w2, b2, w3, b3 = params
    w1p = _pad2(w1, IN_DIM, H1_PAD).astype(compute_dtype)
    w2p = _pad2(w2, H1_PAD, H2_PAD).astype(compute_dtype)
    w3p = _pad2(w3, H2_PAD, OUT_PAD).astype(compute_dtype)
    b1p = _pad2(b1.reshape(1, -1), 1, H1_PAD).astype(jnp.float32)
    b2p = _pad2(b2.reshape(1, -1), 1, H2_PAD).astype(jnp.float32)
    b3p = _pad2(b3.reshape(1, -1), 1, OUT_PAD).astype(jnp.float32)
    return (w1p, b1p, w2p, b2p, w3p, b3p)


# -----------------------------------------------------------------------------
# Per-generation tiling heuristics.
# -----------------------------------------------------------------------------
def _tpu_generation():
    try:
        kind = jax.devices()[0].device_kind.lower()
    except Exception:
        return "other"
    if "v5" in kind:
        return "v5e"
    if "v6" in kind:
        return "v6e"
    if "v7" in kind:
        return "v7x"
    return "other"


def _auto_tile(B, compute_dtype, gen):
    bf16 = jnp.dtype(compute_dtype) == jnp.dtype(jnp.bfloat16)
    row_gran = 16 if bf16 else 8          # bf16 packs 16 rows per vreg
    if B <= 256:
        # Latency path: one tile, rounded to the sublane pack.
        return _round_up(B, row_gran)
    # VMEM-safe caps (the x tile is double-buffered by the pipeline).
    if gen == "v5e":                       # 16 MiB default scoped VMEM
        max_tile = 1024 if bf16 else 512
    elif gen == "v6e":                     # 128 MiB VMEM: amortize per-step overhead
        max_tile = 2048 if bf16 else 1024
    elif gen == "v7x":                     # 64 MiB VMEM per TC
        max_tile = 1024
    else:
        max_tile = 1024 if bf16 else 512
    if gen == "v7x":
        # Force >= 2 tiles so the "parallel" grid axis shards over both TCs.
        tb = _round_up(-(-B // 2), 256)
    else:
        tb = _round_up(B, 256)
    return max(256, min(max_tile, tb))


# -----------------------------------------------------------------------------
# pallas_call builder.
# -----------------------------------------------------------------------------
def _build_call(tb, n_tiles, compute_dtype, out_dtype, single_buffered,
                vmem_limit_bytes):
    def wspec(shape):
        if single_buffered:
            # Grid-invariant weights/biases: single-buffer to free VMEM.
            return pl.BlockSpec(shape, lambda i: (0, 0),
                                pipeline_mode=pl.Buffered(1))
        return pl.BlockSpec(shape, lambda i: (0, 0))

    Bp = n_tiles * tb
    cd_bytes = jnp.dtype(compute_dtype).itemsize
    out_bytes = jnp.dtype(out_dtype).itemsize
    w_elems = IN_DIM * H1_PAD + H1_PAD * H2_PAD + H2_PAD * OUT_PAD
    cost = pl.CostEstimate(
        flops=2 * Bp * w_elems,
        transcendentals=0,
        bytes_accessed=(Bp * IN_DIM * cd_bytes             # x stream
                        + w_elems * cd_bytes               # weights
                        + (H1_PAD + H2_PAD + OUT_PAD) * 4  # biases (f32)
                        + Bp * OUT_PAD * out_bytes),       # output writeback
    )

    cp = dict(dimension_semantics=("parallel",))
    if vmem_limit_bytes is not None:
        cp["vmem_limit_bytes"] = vmem_limit_bytes

    return pl.pallas_call(
        mlp_kernel,
        out_shape=jax.ShapeDtypeStruct((Bp, OUT_PAD), out_dtype),
        grid_spec=pltpu.PrefetchScalarGridSpec(
            num_scalar_prefetch=0,
            grid=(n_tiles,),
            in_specs=[
                pl.BlockSpec((tb, IN_DIM), lambda i: (i, 0)),  # streamed x tile
                wspec((IN_DIM, H1_PAD)),                        # w1
                wspec((1, H1_PAD)),                             # b1
                wspec((H1_PAD, H2_PAD)),                        # w2
                wspec((1, H2_PAD)),                             # b2
                wspec((H2_PAD, OUT_PAD)),                       # w3
                wspec((1, OUT_PAD)),                            # b3
            ],
            out_specs=pl.BlockSpec((tb, OUT_PAD), lambda i: (i, 0)),
        ),
        compiler_params=pltpu.CompilerParams(**cp),
        cost_estimate=cost,
    )


# -----------------------------------------------------------------------------
# Forward pass.
# -----------------------------------------------------------------------------
def nnet3_forward(x, params, *, batch_tile=None, out_dtype=None,
                  vmem_limit_bytes=None, return_padded=False):
    """x: (B, 784).  params: output of prepare_params() (preferred), or raw
    f32 (w1, b1, w2, b2, w3, b3) which is padded/cast on the fly (slower).

    Returns (B, 10) in `out_dtype` (default: the compute dtype, bf16 for the
    default prepare_params), or the raw padded (Bp, 128) slab when
    return_padded=True (rows >= B carry bias-propagated padding values; lanes
    >= 10 are exactly zero).
    """
    if params[0].shape != (IN_DIM, H1_PAD):
        # Unprepared raw params: pad/cast here (hoist via prepare_params()).
        params = prepare_params(params)
    w1p, b1p, w2p, b2p, w3p, b3p = params
    compute_dtype = w1p.dtype
    if out_dtype is None:
        out_dtype = compute_dtype

    B = x.shape[0]
    gen = _tpu_generation()
    if batch_tile is None:
        tb = _auto_tile(B, compute_dtype, gen)
    else:
        row_gran = 16 if jnp.dtype(compute_dtype) == jnp.dtype(jnp.bfloat16) else 8
        tb = _round_up(batch_tile, row_gran)
    n_tiles = pl.cdiv(B, tb)
    Bp = n_tiles * tb

    if vmem_limit_bytes is None and gen == "v6e" and tb >= 1024:
        # 128 MiB physical VMEM on v6e; default scoped limit is 32 MiB.
        vmem_limit_bytes = 64 << 20

    xp = x.astype(compute_dtype)
    if Bp != B:                            # ragged batch: zero-pad rows
        xp = jnp.pad(xp, ((0, Bp - B), (0, 0)))

    call = _build_call(tb, n_tiles, compute_dtype, out_dtype,
                       _single_buffer_supported(), vmem_limit_bytes)
    out = call(xp, w1p, b1p, w2p, b2p, w3p, b3p)
    if return_padded:
        return out
    return out[:B, :OUT_DIM]


# -----------------------------------------------------------------------------
# Init / reference (for testing).
# -----------------------------------------------------------------------------
def init_params(key):
    """Deterministic init mimicking nn.Linear's Kaiming-uniform-ish bounds.

    Weights stored as (in_features, out_features) so the kernel computes
    y = x @ W + b (transpose of PyTorch's (out, in) layout; same semantics).
    """
    ks = jax.random.split(key, 6)

    def linear(kw, kb, fan_in, fan_out):
        bound = 1.0 / jnp.sqrt(fan_in)
        w = jax.random.uniform(kw, (fan_in, fan_out), jnp.float32, -bound, bound)
        b = jax.random.uniform(kb, (1, fan_out), jnp.float32, -bound, bound)
        return w, b

    w1, b1 = linear(ks[0], ks[1], IN_DIM, H1)
    w2, b2 = linear(ks[2], ks[3], H1, H2)
    w3, b3 = linear(ks[4], ks[5], H2, OUT_DIM)
    return (w1, b1, w2, b2, w3, b3)


def nnet3_reference(x, params):
    w1, b1, w2, b2, w3, b3 = params
    h1 = jnp.maximum(x @ w1 + b1, 0.0)
    h2 = jnp.maximum(h1 @ w2 + b2, 0.0)
    return h2 @ w3 + b3


if __name__ == "__main__":
    key = jax.random.PRNGKey(0)
    kx, kp = jax.random.split(key)

    B = 8
    x = jax.random.normal(kx, (B, IN_DIM), jnp.float32)
    params = init_params(kp)
    ref = nnet3_reference(x, params)

    # Default path: bf16 inputs/weights/output, f32 MXU accumulation.
    prep_bf16 = prepare_params(params)                  # one-time weight prep
    out_bf16 = jax.block_until_ready(nnet3_forward(x, prep_bf16))
    assert out_bf16.shape == (B, OUT_DIM)
    assert jnp.allclose(out_bf16.astype(jnp.float32), ref, atol=5e-2, rtol=5e-2), \
        "bf16 mismatch vs reference"

    # Exact f32 path.
    prep_f32 = prepare_params(params, compute_dtype=jnp.float32)
    out_f32 = jax.block_until_ready(nnet3_forward(x, prep_f32))
    assert out_f32.shape == (B, OUT_DIM)
    assert jnp.allclose(out_f32, ref, atol=1e-4, rtol=1e-4), \
        "f32 mismatch vs reference"

    # Multi-tile (grid > 1) + ragged-batch path.
    B2 = 600
    x2 = jax.random.normal(kx, (B2, IN_DIM), jnp.float32)
    ref2 = nnet3_reference(x2, params)
    out2 = jax.block_until_ready(nnet3_forward(x2, prep_bf16, batch_tile=256))
    assert out2.shape == (B2, OUT_DIM)
    assert jnp.allclose(out2.astype(jnp.float32), ref2, atol=5e-2, rtol=5e-2), \
        "multi-tile bf16 mismatch vs reference"

    print("KERNEL_OK")
</pallas_src>

<mosaic_0001>
module attributes {stable_mosaic.version = 11 : i64} {
  func.func @_probe(%arg0: i32, %arg1: memref<8x128xf32, #tpu.memory_space<vmem>>, %arg2: memref<8x128xf32, #tpu.memory_space<vmem>>, %arg3: memref<1x128xf32, #tpu.memory_space<vmem>>, %arg4: memref<8x128xf32, #tpu.memory_space<vmem>>) attributes {dimension_semantics = [#tpu.dimension_semantics<arbitrary>], iteration_bounds = array<i64: 2>, scalar_prefetch = 0 : i64, scratch_operands = 0 : i64, tpu.core_type = #tpu.core_type<tc>, window_params = [{transform_indices = @transform_0, window_bounds = array<i64: 8, 128>}, {pipeline_mode = #tpu.pipeline_mode<synchronous>, transform_indices = @transform_1, window_bounds = array<i64: 8, 128>}, {pipeline_mode = #tpu.pipeline_mode<synchronous>, transform_indices = @transform_2, window_bounds = array<i64: 1, 128>}, {transform_indices = @transform_3, window_bounds = array<i64: 8, 128>}]} {
    %c0 = arith.constant 0 : index
    %c0_0 = arith.constant 0 : index
    %0 = vector.load %arg1[%c0, %c0_0] : memref<8x128xf32, #tpu.memory_space<vmem>>, vector<8x128xf32>
    %c0_1 = arith.constant 0 : index
    %c0_2 = arith.constant 0 : index
    %1 = vector.load %arg2[%c0_1, %c0_2] : memref<8x128xf32, #tpu.memory_space<vmem>>, vector<8x128xf32>
    %2 = arith.addf %0, %1 : vector<8x128xf32>
    %c0_3 = arith.constant 0 : index
    %c0_4 = arith.constant 0 : index
    %3 = vector.load %arg3[%c0_3, %c0_4] : memref<1x128xf32, #tpu.memory_space<vmem>>, vector<1x128xf32>
    %4 = vector.broadcast %3 : vector<1x128xf32> to vector<8x128xf32>
    %5 = arith.addf %2, %4 : vector<8x128xf32>
    %c0_5 = arith.constant 0 : index
    %c0_6 = arith.constant 0 : index
    %6 = vector.load %arg4[%c0_5, %c0_6] : memref<8x128xf32, #tpu.memory_space<vmem>>, vector<8x128xf32>
    tpu.vector_store %arg4[%c0_5, %c0_6], %5 {strides = array<i32>} : memref<8x128xf32, #tpu.memory_space<vmem>>, vector<8x128xf32>,
    return
  }
  func.func @transform_0(%arg0: i32) -> (i32, i32) {
    %c0_i32 = arith.constant 0 : i32
    %c0_i32_0 = arith.constant 0 : i32
    return %arg0, %c0_i32 : i32, i32
  }
  func.func @transform_1(%arg0: i32) -> (i32, i32) {
    %c0_i32 = arith.constant 0 : i32
    %c0_i32_0 = arith.constant 0 : i32
    %c0_i32_1 = arith.constant 0 : i32
    return %c0_i32, %c0_i32_0 : i32, i32
  }
  func.func @transform_2(%arg0: i32) -> (i32, i32) {
    %c0_i32 = arith.constant 0 : i32
    %c0_i32_0 = arith.constant 0 : i32
    %c0_i32_1 = arith.constant 0 : i32
    return %c0_i32, %c0_i32_0 : i32, i32
  }
  func.func @transform_3(%arg0: i32) -> (i32, i32) {
    %c0_i32 = arith.constant 0 : i32
    %c0_i32_0 = arith.constant 0 : i32
    return %arg0, %c0_i32 : i32, i32
  }
}

module attributes {stable_mosaic.version = 11 : i64} {
  func.func @mlp_kernel(%arg0: i32, %arg1: memref<16x784xbf16, #tpu.memory_space<vmem>>, %arg2: memref<784x512xbf16, #tpu.memory_space<vmem>>, %arg3: memref<1x512xf32, #tpu.memory_space<vmem>>, %arg4: memref<512x256xbf16, #tpu.memory_space<vmem>>, %arg5: memref<1x256xf32, #tpu.memory_space<vmem>>, %arg6: memref<256x128xbf16, #tpu.memory_space<vmem>>, %arg7: memref<1x128xf32, #tpu.memory_space<vmem>>, %arg8: memref<16x128xbf16, #tpu.memory_space<vmem>>) attributes {dimension_semantics = [#tpu.dimension_semantics<parallel>], iteration_bounds = array<i64: 1>, scalar_prefetch = 0 : i64, scratch_operands = 0 : i64, tpu.core_type = #tpu.core_type<tc>, window_params = [{transform_indices = @transform_0, window_bounds = array<i64: 16, 784>}, {pipeline_mode = #tpu.pipeline_mode<synchronous>, transform_indices = @transform_1, window_bounds = array<i64: 784, 512>}, {pipeline_mode = #tpu.pipeline_mode<synchronous>, transform_indices = @transform_2, window_bounds = array<i64: 1, 512>}, {pipeline_mode = #tpu.pipeline_mode<synchronous>, transform_indices = @transform_3, window_bounds = array<i64: 512, 256>}, {pipeline_mode = #tpu.pipeline_mode<synchronous>, transform_indices = @transform_4, window_bounds = array<i64: 1, 256>}, {pipeline_mode = #tpu.pipeline_mode<synchronous>, transform_indices = @transform_5, window_bounds = array<i64: 256, 128>}, {pipeline_mode = #tpu.pipeline_mode<synchronous>, transform_indices = @transform_6, window_bounds = array<i64: 1, 128>}, {transform_indices = @transform_7, window_bounds = array<i64: 16, 128>}]} {
    %c0 = arith.constant 0 : index
    %c0_0 = arith.constant 0 : index
    %0 = vector.load %arg1[%c0, %c0_0] : memref<16x784xbf16, #tpu.memory_space<vmem>>, vector<16x784xbf16>
    %c0_1 = arith.constant 0 : index
    %c0_2 = arith.constant 0 : index
    %1 = vector.load %arg2[%c0_1, %c0_2] : memref<784x512xbf16, #tpu.memory_space<vmem>>, vector<784x512xbf16>
    %cst = arith.constant dense<0.000000e+00> : vector<16x512xf32>
    %2 = tpu.matmul %0, %1, %cst {dimension_numbers = #tpu.dot_dimension_numbers<[1], [0], [0], [1], [0, 0, 1, 1], [], []>} : vector<16x784xbf16>, vector<784x512xbf16>, vector<16x512xf32> -> vector<16x512xf32>
    %c0_3 = arith.constant 0 : index
    %c0_4 = arith.constant 0 : index
    %3 = vector.load %arg3[%c0_3, %c0_4] : memref<1x512xf32, #tpu.memory_space<vmem>>, vector<1x512xf32>
    %4 = vector.broadcast %3 : vector<1x512xf32> to vector<16x512xf32>
    %5 = arith.addf %2, %4 : vector<16x512xf32>
    %cst_5 = arith.constant 0.000000e+00 : f32
    %6 = vector.broadcast %cst_5 : f32 to vector<16x512xf32>
    %7 = arith.maximumf %5, %6 : vector<16x512xf32>
    %8 = arith.truncf %7 : vector<16x512xf32> to vector<16x512xbf16>
    %c0_6 = arith.constant 0 : index
    %c0_7 = arith.constant 0 : index
    %9 = vector.load %arg4[%c0_6, %c0_7] : memref<512x256xbf16, #tpu.memory_space<vmem>>, vector<512x256xbf16>
    %cst_8 = arith.constant dense<0.000000e+00> : vector<16x256xf32>
    %10 = tpu.matmul %8, %9, %cst_8 {dimension_numbers = #tpu.dot_dimension_numbers<[1], [0], [0], [1], [0, 0, 1, 1], [], []>} : vector<16x512xbf16>, vector<512x256xbf16>, vector<16x256xf32> -> vector<16x256xf32>
    %c0_9 = arith.constant 0 : index
    %c0_10 = arith.constant 0 : index
    %11 = vector.load %arg5[%c0_9, %c0_10] : memref<1x256xf32, #tpu.memory_space<vmem>>, vector<1x256xf32>
    %12 = vector.broadcast %11 : vector<1x256xf32> to vector<16x256xf32>
    %13 = arith.addf %10, %12 : vector<16x256xf32>
    %cst_11 = arith.constant 0.000000e+00 : f32
    %14 = vector.broadcast %cst_11 : f32 to vector<16x256xf32>
    %15 = arith.maximumf %13, %14 : vector<16x256xf32>
    %16 = arith.truncf %15 : vector<16x256xf32> to vector<16x256xbf16>
    %c0_12 = arith.constant 0 : index
    %c0_13 = arith.constant 0 : index
    %17 = vector.load %arg6[%c0_12, %c0_13] : memref<256x128xbf16, #tpu.memory_space<vmem>>, vector<256x128xbf16>
    %cst_14 = arith.constant dense<0.000000e+00> : vector<16x128xf32>
    %18 = tpu.matmul %16, %17, %cst_14 {dimension_numbers = #tpu.dot_dimension_numbers<[1], [0], [0], [1], [0, 0, 1, 1], [], []>} : vector<16x256xbf16>, vector<256x128xbf16>, vector<16x128xf32> -> vector<16x128xf32>
    %c0_15 = arith.constant 0 : index
    %c0_16 = arith.constant 0 : index
    %19 = vector.load %arg7[%c0_15, %c0_16] : memref<1x128xf32, #tpu.memory_space<vmem>>, vector<1x128xf32>
    %20 = vector.broadcast %19 : vector<1x128xf32> to vector<16x128xf32>
    %21 = arith.addf %18, %20 : vector<16x128xf32>
    %22 = arith.truncf %21 : vector<16x128xf32> to vector<16x128xbf16>
    %c0_17 = arith.constant 0 : index
    %c0_18 = arith.constant 0 : index
    %23 = vector.load %arg8[%c0_17, %c0_18] : memref<16x128xbf16, #tpu.memory_space<vmem>>, vector<16x128xbf16>
    tpu.vector_store %arg8[%c0_17, %c0_18], %22 {strides = array<i32>} : memref<16x128xbf16, #tpu.memory_space<vmem>>, vector<16x128xbf16>,
    return
  }
  func.func @transform_0(%arg0: i32) -> (i32, i32) {
    %c0_i32 = arith.constant 0 : i32
    %c0_i32_0 = arith.constant 0 : i32
    return %arg0, %c0_i32 : i32, i32
  }
  func.func @transform_1(%arg0: i32) -> (i32, i32) {
    %c0_i32 = arith.constant 0 : i32
    %c0_i32_0 = arith.constant 0 : i32
    %c0_i32_1 = arith.constant 0 : i32
    return %c0_i32, %c0_i32_0 : i32, i32
  }
  func.func @transform_2(%arg0: i32) -> (i32, i32) {
    %c0_i32 = arith.constant 0 : i32
    %c0_i32_0 = arith.constant 0 : i32
    %c0_i32_1 = arith.constant 0 : i32
    return %c0_i32, %c0_i32_0 : i32, i32
  }
  func.func @transform_3(%arg0: i32) -> (i32, i32) {
    %c0_i32 = arith.constant 0 : i32
    %c0_i32_0 = arith.constant 0 : i32
    %c0_i32_1 = arith.constant 0 : i32
    return %c0_i32, %c0_i32_0 : i32, i32
  }
  func.func @transform_4(%arg0: i32) -> (i32, i32) {
    %c0_i32 = arith.constant 0 : i32
    %c0_i32_0 = arith.constant 0 : i32
    %c0_i32_1 = arith.constant 0 : i32
    return %c0_i32, %c0_i32_0 : i32, i32
  }
  func.func @transform_5(%arg0: i32) -> (i32, i32) {
    %c0_i32 = arith.constant 0 : i32
    %c0_i32_0 = arith.constant 0 : i32
    %c0_i32_1 = arith.constant 0 : i32
    return %c0_i32, %c0_i32_0 : i32, i32
  }
  func.func @transform_6(%arg0: i32) -> (i32, i32) {
    %c0_i32 = arith.constant 0 : i32
    %c0_i32_0 = arith.constant 0 : i32
    %c0_i32_1 = arith.constant 0 : i32
    return %c0_i32, %c0_i32_0 : i32, i32
  }
  func.func @transform_7(%arg0: i32) -> (i32, i32) {
    %c0_i32 = arith.constant 0 : i32
    %c0_i32_0 = arith.constant 0 : i32
    return %arg0, %c0_i32 : i32, i32
  }
}

</mosaic_0001>

<bundles_post_ra>
// kernel: tpu_custom_call.1
= control target key start
LH: loop header
LB: loop body
LE: loop exit
PB: predicated region body
PF: predicated region fallthrough
CT: control target
= control target key end

     0   :  { %8 = vsyncpa [#allocation3], 0  ;;  %s674_s0 = inlined_call_operand.hbm [shape: f32[16,128], index: 0, kind: input, shape index: {}]   ;;  %s675_s1 = inlined_call_operand.hbm [shape: f32[8,128], index: 1, kind: input, shape index: {}]   ;;  %s676_s2 = inlined_call_operand.vmem [shape: f32[1,128], index: 2, kind: input, shape index: {}]   ;;  %s677_s3 = inlined_call_operand.hbm [shape: f32[16,128], index: 3, kind: output, shape index: {}]  }
   0x1   :  { %10 = vsyncpa [#allocation3 + $0x1], 0 }
   0x2   :  { %11 = vsyncpa [#allocation6], 0 }
   0x3   :  { %12 = vsyncpa [#allocation4], 0 }
   0x4   :  { %14 = vsyncpa [#allocation4 + $0x1], 0  ;;  %s533_s12 = smov 0   ;;  %s535_s13 = smov 0  }
   0x5   :  { %s537_s14 = smov 0   ;;  %s539_s15 = smov 0  }
   0x6 LB: > { %s554_s16 = sadd.s32 4294967295, %s510_s15   ;;  %s308_s17 = sadd.s32 4294967294, %s510_s15   ;;  %s510_s15 = sphi %s539_s15, %s687_s15   ;;  %s506_s14 = sphi %s537_s14, %s686_s14   ;;  %s502_s13 = sphi %s535_s13, %s685_s13   ;;  %s498_s12 = sphi %s533_s12, %s684_s12  }
   0x7   : > { %p40_p0 = scmp.ne.s32.totalorder %s502_s13, %s498_s12  ;;  %p41_p1 = scmp.eq.s32.totalorder %s554_s16, 0 }
   0x8   : > { %p106_p2 = scmp.eq.s32.totalorder %s554_s16, 1  ;;  %p112_p3 = scmp.eq.s32.totalorder %s308_s17, 1 }
   0x9   : > { %p563_p4 = por %p41_p1, %p40_p0  ;;  %p309_p5 = scmp.ge.s32.totalorder %s510_s15, 1 }
   0xa   : > { %p568_p6 = por %p112_p3, %p40_p0  ;;  %p119_p7 = scmp.lt.s32.totalorder %s510_s15, 3 }
   0xb   : > { %s131_s22 = sshll.u32 %s675_s1, 4  ;;  %s512_s24 = smov [#allocation5]   ;;  %s132_s22 = int_to_ptr.hbm [resolvable:$true] %s131_s22 }
   0xc   : > { %p576_p8 = pnand %p309_p5, %p119_p7  ;;  %s133_s25 = sshll.u32 %s512_s24, 4  ;;  %s134_s25 = int_to_ptr.vmem [resolvable:$true] %s133_s25 }
   0xd   : > { %s586_s26 = sadd.s32 1, %s510_s15   ;;  %s27_s27 = sadd.s32 1, %s506_s14 }
   0xe   : > { %p330_p10 = pneg %p576_p8  ;;  %s24_s28 = ssub.s32 %s510_s15, %s586_s26 }
   0xf   : > { %p25_p12 = scmp.eq.s32.totalorder %s24_s28, 0  ;;  %p34_p13 = scmp.ne.s32.totalorder %s506_s14, %s502_s13 }
  0x10   : > { %p331_p11 = pnand %p330_p10, %p41_p1  ;;  %p35_p0 = scmp.eq.s32.totalorder %s510_s15, 0 }
  0x11   : > { %s595_s29 = scalar_select %p25_p12, %s506_s14, %s27_s27  }
  0x12   : > { %333 = dma.hbm_to_vmem [thread:$0]  (!%p331_p11), %s132_s22, 128, %s134_s25, [#allocation6]  }
  0x13   : > { %p599_p3 = por %p106_p2, %p34_p13  ;;  %p343_p5 = scmp.lt.s32.totalorder %s510_s15, 2 }
  0x14   : > { %s147_s4 = sand.u32 1, %s506_s14   ;;  %s313_s5 = sshll.u32 %s510_s15, 3 }
  0x15   : > { %p36_p7 = por %p35_p0, %p34_p13  ;;  %s312_s6 = sshll.u32 %s147_s4, 3 }
  0x16   : > { %s155_s9 = scalar_lea.hbm %s674_s0, %s313_s5  ;;  %s151_s11 = scalar_lea.vmem [#allocation2], %s312_s6 }
  0x17   : > { %s157_s10 = sshll.u32 %s155_s9, 4  ;;  %s159_s17 = sshll.u32 %s151_s11, 4  ;;  %s158_s10 = int_to_ptr.hbm [resolvable:$true] %s157_s10  ;;  %s160_s17 = int_to_ptr.vmem [resolvable:$true] %s159_s17 }
  0x18   : > { %p609_p10 = pnand %p343_p5, %p36_p7  ;;  %s148_s21 = scalar_lea.sflag [#allocation3], %s147_s4 }
  0x19   : > { %s410_s22 = sshra.s32 %s158_s10, 4  ;;  %s417_s28 = scalar_lea.hbm %s674_s0, 16  ;;  %s411_s22 = int_to_ptr.hbm [resolvable:$true] %s410_s22 }
  0x1a   : > { %s412_s24 = scalar_lea.hbm %s411_s22, 8  ;;  %p414_p11 = pneg %p609_p10 }
  0x1b   : > { %p413_p2 = scmp.ne.s32.totalorder %s411_s22, %s412_s24  ;;  %p418_p0 = scmp.lt.s32.totalorder %s411_s22, %s674_s0 }
  0x1c   : > { %p419_p5 = scmp.lt.s32.totalorder %s417_s28, %s412_s24 }
  0x1d   : > { %p415_p12 = pnand %p414_p11, %p413_p2 }
  0x1e   : > { %p420_p7 = por %p419_p5, %p418_p0 }
  0x1f   : > { %p416_p13 = pneg %p415_p12 }
  0x21   : > { %p421_p9 = pnand %p420_p7, %p416_p13 }
  0x23   : > { %424 = shalt.err (!%p421_p9)
}
  0x24   : > { %337 = dma.hbm_to_vmem [thread:$0]  (!%p609_p10), %s158_s10, 128, %s160_s17, %s148_s21  }
  0x25   : > { %168 = sbr.rel (%p576_p8) target bundleno = 60 (0x3c), region = 32  ;;  %s626_s4 = sand.u32 (!%p576_p8), 1, %s502_s13  }
  0x26   : > { %s315_s7 = sshll.u32 (!%p576_p8), %s626_s4, 3  ;;  %s171_s8 = scalar_lea.sflag (!%p576_p8), [#allocation3], %s626_s4 }
  0x27   : > { %s174_s9 = scalar_lea.vmem (!%p576_p8), [#allocation2], %s315_s7 }
  0x2a   : > { %485 = dma.done.wait (%p563_p4), %s171_s8, 128  }
  0x2b   : > { %487 = vsyncadd (%p563_p4), %s171_s8, 4294967168 }
  0x2c   : > { %489 = dma.done.wait (%p41_p1), [#allocation6], 128  }
  0x2d   : > { %491 = vsyncadd (%p41_p1), [#allocation6], 4294967168  ;;  %s319_s23 = sshll.u32 %s554_s16, 3  ;;  %v203_v0 = vld [vmem:[%s174_s9] sm:$0xff]  ;;  %v204_v1 = vld [vmem:[#allocation5] sm:$0xff]  ;;  %s202_s20 = scalar_lea.vmem [#allocation7], %s315_s7 }
  0x2e   : > { %s223_s17 = scalar_lea.hbm %s677_s3, %s319_s23  ;;  %s225_s21 = sshll.u32 %s202_s20, 4  ;;  %v205_v2 = vadd.f32 %v204_v1, %v203_v0  ;;  %v379_v3 = vld [vmem:[%s676_s2] ss:$0 sm:$0xff]  ;;  %s226_s21 = int_to_ptr.vmem [resolvable:$true] %s225_s21 }
  0x2f   : > { %s227_s18 = sshll.u32 %s223_s17, 4  ;;  %s213_s16 = scalar_lea.sflag [#allocation4], %s626_s4  ;;  %s228_s18 = int_to_ptr.hbm [resolvable:$true] %s227_s18 }
  0x30   : > { %v210_v4 = vadd.f32 %v379_v3, %v205_v2  ;;  %s454_s25 = sshra.s32 %s228_s18, 4  ;;  %s460_s6 = scalar_lea.hbm %s677_s3, 16  ;;  %s455_s25 = int_to_ptr.hbm [resolvable:$true] %s454_s25 }
  0x31   : > { %s456_s27 = scalar_lea.hbm %s455_s25, 8  ;;  %p461_p9 = scmp.lt.s32.totalorder %s455_s25, %s677_s3 }
  0x32   : > { %211 = vst [vmem:[%s202_s20] sm:$0xff] %v210_v4  ;;  %p457_p1 = scmp.ne.s32.totalorder %s455_s25, %s456_s27  ;;  %p462_p10 = scmp.lt.s32.totalorder %s460_s6, %s456_s27 }
  0x34   : > { %p458_p4 = pnand %p457_p1, %p599_p3  ;;  %p463_p2 = por %p462_p10, %p461_p9 }
  0x36   : > { %p459_p8 = pneg %p458_p4 }
  0x38   : > { %p464_p11 = pnand %p463_p2, %p459_p8 }
  0x3a   : > { %467 = shalt.err (!%p464_p11)
}
  0x3b   : > { %328 = dma.vmem_to_hbm [thread:$0]  (%p599_p3), %s226_s21, 128, %s228_s18, %s213_s16  }
  0x3c PF: > { %s239_s4 = sand.u32 1, %s498_s12   ;;  %p683_p12 = scmp.ge.s32.totalorder %s510_s15, 2 }
  0x3d   : > { %s240_s9 = scalar_lea.sflag [#allocation4], %s239_s4 }
  0x3e   : > { %p339_p13 = pnand %p683_p12, %p568_p6 }
  0x40   : > { %p340_p0 = pneg %p339_p13 }
  0x42   : > { %493 = dma.done.wait (%p340_p0), %s240_s9, 128  }
  0x43   : > { %495 = vsyncadd (%p340_p0), %s240_s9, 4294967168  ;;  %p17_p5 = scmp.ge.s32.totalorder %s586_s26, 4   ;;  %s684_s12 = smov %s502_s13 }
  0x44   : > { %s685_s13 = smov %s506_s14  ;;  %s686_s14 = smov %s595_s29 }
  0x45   : > { %s687_s15 = smov %s586_s26  ;;  %19 = sbr.rel (!%p17_p5) target bundleno = 6 (0x6), region = 81 }
  0x4a   :  { %246 = vsyncpa [#allocation3], 1 }
  0x4b   :  { %248 = vsyncpa [#allocation3 + $0x1], 1 }
  0x4c   :  { %249 = vsyncpa [#allocation6], 1 }
  0x4d   :  { %250 = vsyncpa [#allocation4], 1 }
  0x4e   :  { %252 = vsyncpa [#allocation4 + $0x1], 1 }

// kernel: tpu_custom_call.1
= control target key start
LH: loop header
LB: loop body
LE: loop exit
PB: predicated region body
PF: predicated region fallthrough
CT: control target
= control target key end

     0   :  { %12 = vsyncpa [#allocation3], 0  ;;  %s4168_s0 = inlined_call_operand.hbm [shape: bf16[16,784], index: 0, kind: input, shape index: {}]   ;;  %s4169_s1 = inlined_call_operand.hbm [shape: bf16[784,512], index: 1, kind: input, shape index: {}]   ;;  %s4170_s2 = inlined_call_operand.hbm [shape: f32[1,512], index: 2, kind: input, shape index: {}]   ;;  %s4171_s3 = inlined_call_operand.hbm [shape: bf16[512,256], index: 3, kind: input, shape index: {}]   ;;  %s4172_s4 = inlined_call_operand.vmem [shape: f32[1,256], index: 4, kind: input, shape index: {}]   ;;  %s4173_s5 = inlined_call_operand.hbm [shape: bf16[256,128], index: 5, kind: input, shape index: {}]   ;;  %s4174_s6 = inlined_call_operand.vmem [shape: f32[1,128], index: 6, kind: input, shape index: {}]   ;;  %s4175_s7 = inlined_call_operand.hbm [shape: bf16[16,128], index: 7, kind: output, shape index: {}]  }
   0x1   :  { %13 = vsyncpa [#allocation6], 0 }
   0x2   :  { %14 = vsyncpa [#allocation9], 0  ;;  %s33_s26 = sshll.u32 %s4169_s1, 4  ;;  %s34_s26 = int_to_ptr.hbm [resolvable:$true] %s33_s26 }
   0x3   :  { %15 = vsyncpa [#allocation4], 0  ;;  %s4025_s27 = smov [#allocation5]   ;;  %s57_s8 = sshll.u32 %s4171_s3, 4  ;;  %s58_s8 = int_to_ptr.hbm [resolvable:$true] %s57_s8 }
   0x4   :  { %s35_s28 = sshll.u32 %s4025_s27, 4  ;;  %s4026_s9 = smov 256   ;;  %s36_s28 = int_to_ptr.vmem [resolvable:$true] %s35_s28 }
   0x5   :  { %s4027_s10 = smov 16   ;;  %s4028_s11 = smov [#allocation8]  }
   0x6   :  { %41 = dma.hbm_to_vmem [thread:$0]  %s34_s26, 25088, %s36_s28, [#allocation6], %s4026_s9, %s4026_s9, %s4027_s10  }
   0x7   :  { %s59_s12 = sshll.u32 %s4028_s11, 4  ;;  %s4029_s13 = smov 128   ;;  %s60_s12 = int_to_ptr.vmem [resolvable:$true] %s59_s12 }
   0x8   :  { %s4030_s14 = smov 8   ;;  %s20_s16 = sshll.u32 %s4168_s0, 4  ;;  %s21_s16 = int_to_ptr.hbm [resolvable:$true] %s20_s16 }
   0x9   :  { %65 = dma.hbm_to_vmem [thread:$0]  %s58_s8, 8192, %s60_s12, [#allocation9], %s4029_s13, %s4029_s13, %s4030_s14  }
   0xa   :  { %s4031_s17 = smov [#allocation2]   ;;  %s47_s20 = sshll.u32 %s4170_s2, 4  ;;  %s48_s20 = int_to_ptr.hbm [resolvable:$true] %s47_s20 }
   0xb   :  { %s22_s18 = sshll.u32 %s4031_s17, 4  ;;  %s4032_s21 = smov 448   ;;  %s23_s18 = int_to_ptr.vmem [resolvable:$true] %s22_s18 }
   0xc   :  { %s4033_s22 = smov 28   ;;  %s4034_s23 = smov [#allocation7]  }
   0xd   :  { %28 = dma.hbm_to_vmem [thread:$0]  %s21_s16, 896, %s23_s18, [#allocation3], %s4032_s21, %s4032_s21, %s4033_s22  }
   0xe   :  { %s49_s24 = sshll.u32 %s4034_s23, 4  ;;  %s72_s27 = sshll.u32 %s4173_s5, 4  ;;  %s50_s24 = int_to_ptr.vmem [resolvable:$true] %s49_s24  ;;  %s73_s27 = int_to_ptr.hbm [resolvable:$true] %s72_s27 }
   0xf   :  { %52 = dma.hbm_to_vmem [thread:$0]  %s48_s20, 64, %s50_s24, [#allocation6]  }
  0x10   :  { %s4035_s0 = smov [#allocation10]   ;;  %s4036_s29 = smov 64  }
  0x11   :  { %s74_s28 = sshll.u32 %s4035_s0, 4  ;;  %s4037_s30 = smov 4   ;;  %s75_s28 = int_to_ptr.vmem [resolvable:$true] %s74_s28 }
  0x12   :  { %80 = dma.hbm_to_vmem [thread:$0]  %s73_s27, 2048, %s75_s28, [#allocation9], %s4036_s29, %s4036_s29, %s4037_s30  }
  0x13   :  { %4017 = dma.done.wait [#allocation3], 896  }
  0x14   :  { %4018 = vsyncadd [#allocation3], 4294966400 }
  0x15   :  { %4019 = dma.done.wait [#allocation6], 25152  }
  0x16   :  { %4020 = vsyncadd [#allocation6], 4294942144 }
  0x17   :  { %4021 = dma.done.wait [#allocation9], 10240  }
  0x18   :  { %4022 = vsyncadd [#allocation9], 4294957056  ;;  %v2576_v0 = vld [vmem:[#allocation5 + $0xe0] sm:$0xf]  ;;  %v3607_v1 = vld [vmem:[#allocation5 + $0xec] sm:$0xf0] }
  0x19   :  { %v2704_v2 = vld [vmem:[#allocation5 + $0x1e0] sm:$0xf]  ;;  %v2577_v3 = vor.u32 %v3607_v1, %v2576_v0  ;;  %v3639_v4 = vld [vmem:[#allocation5 + $0x1ec] sm:$0xf0]  ;;  %vm1333_vm0 = vcmask 130048   ;;  %s4038_s9 = smov [#allocation11]  }
  0x1a   :  { %v2832_v5 = vld [vmem:[#allocation5 + $0x2e0] sm:$0xf]  ;;  %v3671_v6 = vld [vmem:[#allocation5 + $0x2ec] sm:$0xf0]  ;;  %v2705_v7 = vor.u32 %v3639_v4, %v2704_v2  ;;  %s2417_s10 = sshll.u32 %s4038_s9, 4  ;;  %s2419_s13 = sshll.u32 %s4175_s7, 4  ;;  %s2418_s10 = int_to_ptr.vmem [resolvable:$true] %s2417_s10  ;;  %s2420_s13 = int_to_ptr.hbm [resolvable:$true] %s2419_s13 }
  0x1b   :  { %v2833_v8 = vor.u32 %v3671_v6, %v2832_v5  ;;  %v2960_v9 = vld [vmem:[#allocation5 + $0x3e0] sm:$0xf]  ;;  %v3703_v10 = vld [vmem:[#allocation5 + $0x3ec] sm:$0xf0]  ;;  %1337 = vmatpush.bf16.msra.mxu0 %v2577_v3 }
  0x1c   :  { %v2560_v11 = vld [vmem:[#allocation5 + $0xc0] sm:$0xf]  ;;  %v2961_v12 = vor.u32 %v3703_v10, %v2960_v9  ;;  %v3603_v13 = vld [vmem:[#allocation5 + $0xcc] sm:$0xf0]  ;;  %1351 = vmatpush.bf16.msra.mxu1 %v2705_v7 }
  0x1d   :  { %v2688_v14 = vld [vmem:[#allocation5 + $0x1c0] sm:$0xf]  ;;  %v3635_v15 = vld [vmem:[#allocation5 + $0x1cc] sm:$0xf0]  ;;  %1365 = vmatpush.bf16.msra.mxu2 %v2833_v8  ;;  %v2561_v16 = vor.u32 %v3603_v13, %v2560_v11 }
  0x1e   :  { %v2689_v17 = vor.u32 %v3635_v15, %v2688_v14  ;;  %v2816_v18 = vld [vmem:[#allocation5 + $0x2c0] sm:$0xf]  ;;  %v3667_v19 = vld [vmem:[#allocation5 + $0x2cc] sm:$0xf0]  ;;  %1379 = vmatpush.bf16.msra.mxu3 %v2961_v12 }
  0x1f   :  { %v2944_v20 = vld [vmem:[#allocation5 + $0x3c0] sm:$0xf]  ;;  %v2817_v21 = vor.u32 %v3667_v19, %v2816_v18  ;;  %v3699_v22 = vld [vmem:[#allocation5 + $0x3cc] sm:$0xf0]  ;;  %1338 = vmatpush.bf16.msra.mxu0 %v2561_v16 }
  0x20   :  { %v2544_v23 = vld [vmem:[#allocation5 + $0xa0] sm:$0xf]  ;;  %v3599_v24 = vld [vmem:[#allocation5 + $0xac] sm:$0xf0]  ;;  %v2945_v25 = vor.u32 %v3699_v22, %v2944_v20  ;;  %1352 = vmatpush.bf16.msra.mxu1 %v2689_v17 }
  0x21   :  { %v2672_v26 = vld [vmem:[#allocation5 + $0x1a0] sm:$0xf]  ;;  %v3631_v27 = vld [vmem:[#allocation5 + $0x1ac] sm:$0xf0]  ;;  %v2545_v29 = vor.u32 %v3599_v24, %v2544_v23  ;;  %1366 = vmatpush.bf16.msra.mxu2 %v2817_v21 }
  0x22   :  { %v2800_v28 = vld [vmem:[#allocation5 + $0x2a0] sm:$0xf]  ;;  %v3663_v30 = vld [vmem:[#allocation5 + $0x2ac] sm:$0xf0]  ;;  %v2673_v33 = vor.u32 %v3631_v27, %v2672_v26  ;;  %1380 = vmatpush.bf16.msra.mxu3 %v2945_v25 }
  0x23   :  { %v2928_v31 = vld [vmem:[#allocation5 + $0x3a0] sm:$0xf]  ;;  %v3695_v32 = vld [vmem:[#allocation5 + $0x3ac] sm:$0xf0]  ;;  %v2801_v34 = vor.u32 %v3663_v30, %v2800_v28  ;;  %1339 = vmatpush.bf16.msra.mxu0 %v2545_v29 }
  0x24   :  { %v2528_v35 = vld [vmem:[#allocation5 + $0x80] sm:$0xf]  ;;  %v3595_v36 = vld [vmem:[#allocation5 + $0x8c] sm:$0xf0]  ;;  %v2929_v38 = vor.u32 %v3695_v32, %v2928_v31  ;;  %1353 = vmatpush.bf16.msra.mxu1 %v2673_v33  ;;  %v3605_v32 = vld [vmem:[#allocation5 + $0xe4] sm:$0xf] }
  0x25   :  { %v2656_v37 = vld [vmem:[#allocation5 + $0x180] sm:$0xf]  ;;  %v3627_v39 = vld [vmem:[#allocation5 + $0x18c] sm:$0xf0]  ;;  %v2529_v44 = vor.u32 %v3595_v36, %v2528_v35  ;;  %1367 = vmatpush.bf16.msra.mxu2 %v2801_v34  ;;  %v2578_v33 = vld [vmem:[#allocation5 + $0xf0] sm:$0xf0] }
  0x26   :  { %v2784_v40 = vld [vmem:[#allocation5 + $0x280] sm:$0xf]  ;;  %v3659_v41 = vld [vmem:[#allocation5 + $0x28c] sm:$0xf0]  ;;  %v2657_v45 = vor.u32 %v3627_v39, %v2656_v37  ;;  %1381 = vmatpush.bf16.msra.mxu3 %v2929_v38  ;;  %v3574_v36 = vld [vmem:[#allocation2 + $0x20] sm:$0xf0] }
  0x27   :  { %v2912_v42 = vld [vmem:[#allocation5 + $0x380] sm:$0xf]  ;;  %v3691_v43 = vld [vmem:[#allocation5 + $0x38c] sm:$0xf0]  ;;  %v2785_v46 = vor.u32 %v3659_v41, %v2784_v40  ;;  %1340 = vmatpush.bf16.msra.mxu0 %v2529_v44  ;;  %v3637_v41 = vld [vmem:[#allocation5 + $0x1e4] sm:$0xf] }
  0x28   :  { %v2512_v47 = vld [vmem:[#allocation5 + $0x60] sm:$0xf]  ;;  %v3591_v48 = vld [vmem:[#allocation5 + $0x6c] sm:$0xf0]  ;;  %v2913_v50 = vor.u32 %v3691_v43, %v2912_v42  ;;  %1354 = vmatpush.bf16.msra.mxu1 %v2657_v45  ;;  %v2436_v42 = vld [vmem:[#allocation2] sm:$0xf] }
  0x29   :  { %v2640_v49 = vld [vmem:[#allocation5 + $0x160] sm:$0xf]  ;;  %v3623_v51 = vld [vmem:[#allocation5 + $0x16c] sm:$0xf0]  ;;  %v2513_v56 = vor.u32 %v3591_v48, %v2512_v47  ;;  %1368 = vmatpush.bf16.msra.mxu2 %v2785_v46  ;;  %v3573_v43 = vld [vmem:[#allocation2 + $0x18] sm:$0xf0] }
  0x2a   :  { %v2768_v52 = vld [vmem:[#allocation5 + $0x260] sm:$0xf]  ;;  %v3655_v53 = vld [vmem:[#allocation5 + $0x26c] sm:$0xf0]  ;;  %v2641_v57 = vor.u32 %v3623_v51, %v2640_v49  ;;  %1382 = vmatpush.bf16.msra.mxu3 %v2913_v50  ;;  %v2706_v46 = vld [vmem:[#allocation5 + $0x1f0] sm:$0xf0]  ;;  %v2581_v50 = vor.u32 %v3605_v32, %v2578_v33 }
  0x2b   :  { %v2896_v54 = vld [vmem:[#allocation5 + $0x360] sm:$0xf]  ;;  %v3687_v55 = vld [vmem:[#allocation5 + $0x36c] sm:$0xf0]  ;;  %v2769_v58 = vor.u32 %v3655_v53, %v2768_v52  ;;  %1341 = vmatpush.bf16.msra.mxu0 %v2513_v56  ;;  %v3571_v47 = vld [vmem:[#allocation2 + $0xc] sm:$0xf] }
  0x2c   :  { %v2496_v59 = vld [vmem:[#allocation5 + $0x40] sm:$0xf]  ;;  %v3587_v60 = vld [vmem:[#allocation5 + $0x4c] sm:$0xf0]  ;;  %v2897_v62 = vor.u32 %v3687_v55, %v2896_v54  ;;  %1355 = vmatpush.bf16.msra.mxu1 %v2641_v57  ;;  %v4099_v55 = vor.u32 %v3573_v43, %v2436_v42  ;;  %v3601_v57 = vld [vmem:[#allocation5 + $0xc4] sm:$0xf] }
  0x2d   :  { %v2624_v61 = vld [vmem:[#allocation5 + $0x140] sm:$0xf]  ;;  %v3619_v63 = vld [vmem:[#allocation5 + $0x14c] sm:$0xf0]  ;;  %v2497_v4 = vor.u32 %v3587_v60, %v2496_v59  ;;  %1369 = vmatpush.bf16.msra.mxu2 %v2769_v58  ;;  %v2562_v58 = vld [vmem:[#allocation5 + $0xd0] sm:$0xf0] }
  0x2e   :  { %v2752_v0 = vld [vmem:[#allocation5 + $0x240] sm:$0xf]  ;;  %v3651_v1 = vld [vmem:[#allocation5 + $0x24c] sm:$0xf0]  ;;  %v2625_v6 = vor.u32 %v3619_v63, %v2624_v61  ;;  %1383 = vmatpush.bf16.msra.mxu3 %v2897_v62  ;;  %v3570_v61 = vld [vmem:[#allocation2 + $0x4] sm:$0xf]  ;;  %v2709_v63 = vor.u32 %v3637_v41, %v2706_v46 }
  0x2f   :  { %v2880_v2 = vld [vmem:[#allocation5 + $0x340] sm:$0xf]  ;;  %v3683_v3 = vld [vmem:[#allocation5 + $0x34c] sm:$0xf0]  ;;  %v2753_v7 = vor.u32 %v3651_v1, %v2752_v0  ;;  %1342 = vmatpush.bf16.msra.mxu0 %v2497_v4  ;;  %v2438_v62 = vld [vmem:[#allocation2 + $0x1c] sm:$0xf0]  ;;  %v2565_v4 = vor.u32 %v3601_v57, %v2562_v58 }
  0x30   :  { %v2480_v5 = vld [vmem:[#allocation5 + $0x20] sm:$0xf]  ;;  %v3583_v8 = vld [vmem:[#allocation5 + $0x2c] sm:$0xf0]  ;;  %v2881_v11 = vor.u32 %v3683_v3, %v2880_v2  ;;  %1356 = vmatpush.bf16.msra.mxu1 %v2625_v6  ;;  %v3633_v1 = vld [vmem:[#allocation5 + $0x1c4] sm:$0xf] }
  0x31   :  { %v2608_v9 = vld [vmem:[#allocation5 + $0x120] sm:$0xf]  ;;  %v3615_v10 = vld [vmem:[#allocation5 + $0x12c] sm:$0xf0]  ;;  %v2481_v18 = vor.u32 %v3583_v8, %v2480_v5  ;;  %1370 = vmatpush.bf16.msra.mxu2 %v2753_v7  ;;  %v2690_v2 = vld [vmem:[#allocation5 + $0x1d0] sm:$0xf0]  ;;  %v4105_v8 = vor.u32 %v3570_v61, %v2438_v62 }
  0x32   :  { %v2736_v12 = vld [vmem:[#allocation5 + $0x220] sm:$0xf]  ;;  %v3647_v13 = vld [vmem:[#allocation5 + $0x22c] sm:$0xf0]  ;;  %v2609_v23 = vor.u32 %v3615_v10, %v2608_v9  ;;  %1384 = vmatpush.bf16.msra.mxu3 %v2881_v11  ;;  %v3597_v10 = vld [vmem:[#allocation5 + $0xa4] sm:$0xf] }
  0x33   :  { %v2864_v14 = vld [vmem:[#allocation5 + $0x320] sm:$0xf]  ;;  %v3679_v15 = vld [vmem:[#allocation5 + $0x32c] sm:$0xf0]  ;;  %v2737_v24 = vor.u32 %v3647_v13, %v2736_v12  ;;  %1343 = vmatpush.bf16.msra.mxu0 %v2481_v18  ;;  %v2546_v11 = vld [vmem:[#allocation5 + $0xb0] sm:$0xf0]  ;;  %v2693_v12 = vor.u32 %v3633_v1, %v2690_v2 }
  0x34   :  { %v2464_v16 = vld [vmem:[#allocation5] sm:$0xf]  ;;  %v3579_v17 = vld [vmem:[#allocation5 + $0xc] sm:$0xf0]  ;;  %v2865_v28 = vor.u32 %v3679_v15, %v2864_v14  ;;  %1357 = vmatpush.bf16.msra.mxu1 %v2609_v23  ;;  %v3629_v14 = vld [vmem:[#allocation5 + $0x1a4] sm:$0xf] }
  0x35   :  { %v2592_v19 = vld [vmem:[#allocation5 + $0x100] sm:$0xf]  ;;  %v3611_v20 = vld [vmem:[#allocation5 + $0x10c] sm:$0xf0]  ;;  %v2465_v35 = vor.u32 %v3579_v17, %v2464_v16  ;;  %1371 = vmatpush.bf16.msra.mxu2 %v2737_v24  ;;  %v2674_v15 = vld [vmem:[#allocation5 + $0x1b0] sm:$0xf0]  ;;  %v2549_v17 = vor.u32 %v3597_v10, %v2546_v11 }
  0x36   :  { %v2720_v21 = vld [vmem:[#allocation5 + $0x200] sm:$0xf]  ;;  %v3643_v22 = vld [vmem:[#allocation5 + $0x20c] sm:$0xf0]  ;;  %v2593_v39 = vor.u32 %v3611_v20, %v2592_v19  ;;  %1385 = vmatpush.bf16.msra.mxu3 %v2865_v28  ;;  %v2530_v23 = vld [vmem:[#allocation5 + $0x90] sm:$0xf0]  ;;  %v2677_v24 = vor.u32 %v3629_v14, %v2674_v15 }
  0x37   :  { %v2848_v25 = vld [vmem:[#allocation5 + $0x300] sm:$0xf]  ;;  %v3675_v26 = vld [vmem:[#allocation5 + $0x30c] sm:$0xf0]  ;;  %v2721_v40 = vor.u32 %v3643_v22, %v2720_v21  ;;  %1344 = vmatpush.bf16.msra.mxu0 %v2465_v35  ;;  %v3593_v22 = vld [vmem:[#allocation5 + $0x84] sm:$0xf] }
  0x38   :  { %v3088_v27 = vld [vmem:[#allocation5 + $0x4e0] sm:$0xf]  ;;  %v3735_v29 = vld [vmem:[#allocation5 + $0x4ec] sm:$0xf0]  ;;  %v2849_v44 = vor.u32 %v3675_v26, %v2848_v25  ;;  %1358 = vmatpush.bf16.msra.mxu1 %v2593_v39  ;;  %v3625_v26 = vld [vmem:[#allocation5 + $0x184] sm:$0xf] }
  0x39   :  { %v3216_v30 = vld [vmem:[#allocation5 + $0x5e0] sm:$0xf]  ;;  %v3767_v31 = vld [vmem:[#allocation5 + $0x5ec] sm:$0xf0]  ;;  %v3089_v45 = vor.u32 %v3735_v29, %v3088_v27  ;;  %1372 = vmatpush.bf16.msra.mxu2 %v2721_v40  ;;  %v2658_v27 = vld [vmem:[#allocation5 + $0x190] sm:$0xf0]  ;;  %v2533_v29 = vor.u32 %v3593_v22, %v2530_v23 }
  0x3a   :  { %v2444_v34 = vld [vmem:[#allocation2 + $0x8] sm:$0xf]  ;;  %v3232_v37 = vld [vmem:[#allocation5 + $0x600] sm:$0xf]  ;;  %v3217_v49 = vor.u32 %v3767_v31, %v3216_v30  ;;  %1386 = vmatpush.bf16.msra.mxu3 %v2849_v44  ;;  %1345 = vmatmul.bf16.vlgmr.msra.gmra.mxu0 %v4099_v55  ;;  %v2514_v35 = vld [vmem:[#allocation5 + $0x70] sm:$0xf0] }
  0x3b   :  { %v3771_v38 = vld [vmem:[#allocation5 + $0x60c] sm:$0xf0]  ;;  %v3072_v51 = vld [vmem:[#allocation5 + $0x4c0] sm:$0xf]  ;;  %v4097_v54 = vor.u32 %v3574_v36, %v2444_v34  ;;  %1393 = vmatpush.bf16.msrb.mxu0 %v3089_v45  ;;  %1359 = vmatmul.bf16.vlgmr.msra.gmra.mxu1 %v4105_v8  ;;  %v3589_v34 = vld [vmem:[#allocation5 + $0x64] sm:$0xf] }
  0x3c   :  { %v2446_v48 = vld [vmem:[#allocation2 + $0x24] sm:$0xf0]  ;;  %v3200_v53 = vld [vmem:[#allocation5 + $0x5c0] sm:$0xf]  ;;  %v3233_v59 = vor.u32 %v3771_v38, %v3232_v37  ;;  %1407 = vmatpush.bf16.msrb.mxu1 %v3217_v49  ;;  %v3576_v37 = vld [vmem:[#allocation2 + $0x30] sm:$0xf0]  ;;  %v2661_v38 = vor.u32 %v3625_v26, %v2658_v27  ;;  %v2517_v43 = vor.u32 %v3589_v34, %v2514_v35 }
  0x3d   :  { %v3731_v52 = vld [vmem:[#allocation5 + $0x4cc] sm:$0xf0]  ;;  %v4101_v60 = vor.u32 %v3571_v47, %v2446_v48  ;;  %v3056_v5 = vld [vmem:[#allocation5 + $0x4a0] sm:$0xf]  ;;  %1373 = vmatmul.bf16.vlgmr.msra.gmra.mxu2 %v4097_v54  ;;  %v3621_v40 = vld [vmem:[#allocation5 + $0x164] sm:$0xf] }
  0x3e   :  { %v3763_v56 = vld [vmem:[#allocation5 + $0x5cc] sm:$0xf0]  ;;  %v3073_v0 = vor.u32 %v3731_v52, %v3072_v51  ;;  %1435 = vmatpush.bf16.msrb.mxu3 %v2581_v50  ;;  %v3184_v7 = vld [vmem:[#allocation5 + $0x5a0] sm:$0xf]  ;;  %1428 = vmatpush.bf16.msrb.mxu2 %v3233_v59  ;;  %v2642_v41 = vld [vmem:[#allocation5 + $0x170] sm:$0xf0] }
  0x3f   :  { %v3201_v3 = vor.u32 %v3763_v56, %v3200_v53  ;;  %v3727_v6 = vld [vmem:[#allocation5 + $0x4ac] sm:$0xf0]  ;;  %1387 = vmatmul.bf16.vlgmr.msra.gmra.mxu3 %v4101_v60  ;;  %v3040_v18 = vld [vmem:[#allocation5 + $0x480] sm:$0xf]  ;;  %v3585_v48 = vld [vmem:[#allocation5 + $0x44] sm:$0xf]  ;;  %v2645_v51 = vor.u32 %v3621_v40, %v2642_v41 }
  0x40   :  { %v3759_v9 = vld [vmem:[#allocation5 + $0x5ac] sm:$0xf0]  ;;  %1394 = vmatpush.bf16.msrb.mxu0 %v3073_v0  ;;  %v3057_v13 = vor.u32 %v3727_v6, %v3056_v5  ;;  %v3168_v20 = vld [vmem:[#allocation5 + $0x580] sm:$0xf]  ;;  %v2498_v49 = vld [vmem:[#allocation5 + $0x50] sm:$0xf0] }
  0x41   :  { %1408 = vmatpush.bf16.msrb.mxu1 %v3201_v3  ;;  %v3185_v16 = vor.u32 %v3759_v9, %v3184_v7  ;;  %v3723_v19 = vld [vmem:[#allocation5 + $0x48c] sm:$0xf0]  ;;  %v3024_v30 = vld [vmem:[#allocation5 + $0x460] sm:$0xf]  ;;  %v3617_v53 = vld [vmem:[#allocation5 + $0x144] sm:$0xf]  ;;  %v2501_v58 = vor.u32 %v3585_v48, %v2498_v49 }
  0x42   :  { %1449 = vmatpush.bf16.msra.mxu2 %v2709_v63  ;;  %1436 = vmatpush.bf16.msrb.mxu3 %v2565_v4  ;;  %v3755_v21 = vld [vmem:[#allocation5 + $0x58c] sm:$0xf0]  ;;  %v3041_v25 = vor.u32 %v3723_v19, %v3040_v18  ;;  %v3152_v32 = vld [vmem:[#allocation5 + $0x560] sm:$0xf]  ;;  %v2626_v56 = vld [vmem:[#allocation5 + $0x150] sm:$0xf0] }
  0x43   :  { %v3169_v28 = vor.u32 %v3755_v21, %v3168_v20  ;;  %v3719_v31 = vld [vmem:[#allocation5 + $0x46c] sm:$0xf0]  ;;  %v2460_v36 = vld [vmem:[#allocation2 + $0x18] sm:$0xf]  ;;  %v3581_v0 = vld [vmem:[#allocation5 + $0x24] sm:$0xf]  ;;  %v2629_v4 = vor.u32 %v3617_v53, %v2626_v56 }
  0x44   :  { %1395 = vmatpush.bf16.msrb.mxu0 %v3057_v13  ;;  %v3751_v33 = vld [vmem:[#allocation5 + $0x56c] sm:$0xf0]  ;;  %v3025_v39 = vor.u32 %v3719_v31, %v3024_v30  ;;  %v3008_v44 = vld [vmem:[#allocation5 + $0x440] sm:$0xf]  ;;  %v4109_v50 = vor.u32 %v3576_v37, %v2460_v36  ;;  %v2482_v1 = vld [vmem:[#allocation5 + $0x30] sm:$0xf0] }
  0x45   :  { %1409 = vmatpush.bf16.msrb.mxu1 %v3185_v16  ;;  %v3153_v42 = vor.u32 %v3751_v33, %v3152_v32  ;;  %v3715_v45 = vld [vmem:[#allocation5 + $0x44c] sm:$0xf0]  ;;  %v3136_v46 = vld [vmem:[#allocation5 + $0x540] sm:$0xf]  ;;  %v3613_v2 = vld [vmem:[#allocation5 + $0x124] sm:$0xf]  ;;  %v2485_v11 = vor.u32 %v3581_v0, %v2482_v1 }
  0x46   :  { %1450 = vmatpush.bf16.msra.mxu2 %v2693_v12  ;;  %1437 = vmatpush.bf16.msrb.mxu3 %v2549_v17  ;;  %v3747_v47 = vld [vmem:[#allocation5 + $0x54c] sm:$0xf0]  ;;  %v3009_v52 = vor.u32 %v3715_v45, %v3008_v44  ;;  %v2992_v59 = vld [vmem:[#allocation5 + $0x420] sm:$0xf]  ;;  %v2610_v3 = vld [vmem:[#allocation5 + $0x130] sm:$0xf0] }
  0x47   :  { %v3137_v57 = vor.u32 %v3747_v47, %v3136_v46  ;;  %v3711_v61 = vld [vmem:[#allocation5 + $0x42c] sm:$0xf0]  ;;  %v3120_v62 = vld [vmem:[#allocation5 + $0x520] sm:$0xf]  ;;  %v3577_v13 = vld [vmem:[#allocation5 + $0x4] sm:$0xf]  ;;  %v2613_v21 = vor.u32 %v3613_v2, %v2610_v3 }
  0x48   :  { %1396 = vmatpush.bf16.msrb.mxu0 %v3041_v25  ;;  %v3743_v63 = vld [vmem:[#allocation5 + $0x52c] sm:$0xf0]  ;;  %v2993_v5 = vor.u32 %v3711_v61, %v2992_v59  ;;  %v2976_v6 = vld [vmem:[#allocation5 + $0x400] sm:$0xf]  ;;  %v2466_v14 = vld [vmem:[#allocation5 + $0x10] sm:$0xf0] }
  0x49   :  { %1410 = vmatpush.bf16.msrb.mxu1 %v3169_v28  ;;  %v3707_v7 = vld [vmem:[#allocation5 + $0x40c] sm:$0xf0]  ;;  %v3104_v9 = vld [vmem:[#allocation5 + $0x500] sm:$0xf]  ;;  %v3121_v10 = vor.u32 %v3743_v63, %v3120_v62  ;;  %v3669_v15 = vld [vmem:[#allocation5 + $0x2e4] sm:$0xf]  ;;  %v2469_v27 = vor.u32 %v3577_v13, %v2466_v14 }
  0x4a   :  { %1451 = vmatpush.bf16.msra.mxu2 %v2677_v24  ;;  %1438 = vmatpush.bf16.msrb.mxu3 %v2533_v29  ;;  %v3739_v12 = vld [vmem:[#allocation5 + $0x50c] sm:$0xf0]  ;;  %v2834_v16 = vld [vmem:[#allocation5 + $0x2f0] sm:$0xf0]  ;;  %v3701_v17 = vld [vmem:[#allocation5 + $0x3e4] sm:$0xf]  ;;  %v2977_v22 = vor.u32 %v3707_v7, %v2976_v6 }
  0x4b   :  { %v2962_v18 = vld [vmem:[#allocation5 + $0x3f0] sm:$0xf0]  ;;  %v3733_v19 = vld [vmem:[#allocation5 + $0x4e4] sm:$0xf]  ;;  %v2452_v23 = vld [vmem:[#allocation2 + $0x10] sm:$0xf]  ;;  %v3105_v26 = vor.u32 %v3739_v12, %v3104_v9  ;;  %v2837_v31 = vor.u32 %v3669_v15, %v2834_v16 }
  0x4c   :  { %1397 = vmatpush.bf16.msrb.mxu0 %v3025_v39  ;;  %v3090_v20 = vld [vmem:[#allocation5 + $0x4f0] sm:$0xf0]  ;;  %v3609_v25 = vld [vmem:[#allocation5 + $0x104] sm:$0xf]  ;;  %v3572_v29 = vld [vmem:[#allocation2 + $0x14] sm:$0xf]  ;;  %v2965_v32 = vor.u32 %v3701_v17, %v2962_v18 }
  0x4d   :  { %1411 = vmatpush.bf16.msrb.mxu1 %v3153_v42  ;;  %3246 = vmatmul.msk.bf16.vlgmr.msrb.gmra.mxu2 %vm1333_vm0, %v4109_v50  ;;  %v3575_v24 = vld [vmem:[#allocation2 + $0x28] sm:$0xf0]  ;;  %v2454_v30 = vld [vmem:[#allocation2 + $0x2c] sm:$0xf0]  ;;  %v3765_v33 = vld [vmem:[#allocation5 + $0x5e4] sm:$0xf]  ;;  %v3093_v36 = vor.u32 %v3733_v19, %v3090_v20 }
  0x4e   :  { %1452 = vmatpush.bf16.msra.mxu2 %v2661_v38  ;;  %1439 = vmatpush.bf16.msrb.mxu3 %v2517_v43  ;;  %v2594_v28 = vld [vmem:[#allocation5 + $0x110] sm:$0xf0]  ;;  %v3665_v35 = vld [vmem:[#allocation5 + $0x2c4] sm:$0xf]  ;;  %v4113_v37 = vor.u32 %v3575_v24, %v2452_v23  ;;  %v4115_v42 = vor.u32 %v3572_v29, %v2454_v30 }
  0x4f   :  { %v3218_v34 = vld [vmem:[#allocation5 + $0x5f0] sm:$0xf0]  ;;  %v3697_v39 = vld [vmem:[#allocation5 + $0x3c4] sm:$0xf]  ;;  %v2597_v41 = vor.u32 %v3609_v25, %v2594_v28 }
  0x50   :  { %1398 = vmatpush.bf16.msrb.mxu0 %v3009_v52  ;;  %v2818_v38 = vld [vmem:[#allocation5 + $0x2d0] sm:$0xf0]  ;;  %v3729_v43 = vld [vmem:[#allocation5 + $0x4c4] sm:$0xf]  ;;  %v3221_v45 = vor.u32 %v3765_v33, %v3218_v34 }
  0x51   :  { %1412 = vmatpush.bf16.msrb.mxu1 %v3137_v57  ;;  %v2946_v40 = vld [vmem:[#allocation5 + $0x3d0] sm:$0xf0]  ;;  %v2821_v46 = vor.u32 %v3665_v35, %v2818_v38  ;;  %v3761_v48 = vld [vmem:[#allocation5 + $0x5c4] sm:$0xf] }
  0x52   :  { %1453 = vmatpush.bf16.msra.mxu2 %v2645_v51  ;;  %1440 = vmatpush.bf16.msrb.mxu3 %v2501_v58  ;;  %v3074_v44 = vld [vmem:[#allocation5 + $0x4d0] sm:$0xf0]  ;;  %v2949_v47 = vor.u32 %v3697_v39, %v2946_v40  ;;  %v3661_v51 = vld [vmem:[#allocation5 + $0x2a4] sm:$0xf] }
  0x53   :  { %v3202_v49 = vld [vmem:[#allocation5 + $0x5d0] sm:$0xf0]  ;;  %v3077_v52 = vor.u32 %v3729_v43, %v3074_v44  ;;  %v3693_v56 = vld [vmem:[#allocation5 + $0x3a4] sm:$0xf] }
  0x54   :  { %1399 = vmatpush.bf16.msrb.mxu0 %v2993_v5  ;;  %v2802_v53 = vld [vmem:[#allocation5 + $0x2b0] sm:$0xf0]  ;;  %v3725_v58 = vld [vmem:[#allocation5 + $0x4a4] sm:$0xf]  ;;  %v3205_v61 = vor.u32 %v3761_v48, %v3202_v49 }
  0x55   :  { %1413 = vmatpush.bf16.msrb.mxu1 %v3121_v10  ;;  %v2930_v57 = vld [vmem:[#allocation5 + $0x3b0] sm:$0xf0]  ;;  %v2805_v62 = vor.u32 %v3661_v51, %v2802_v53  ;;  %v3757_v0 = vld [vmem:[#allocation5 + $0x5a4] sm:$0xf] }
  0x56   :  { %1454 = vmatpush.bf16.msra.mxu2 %v2629_v4  ;;  %1441 = vmatpush.bf16.msrb.mxu3 %v2485_v11  ;;  %v3058_v59 = vld [vmem:[#allocation5 + $0x4b0] sm:$0xf0]  ;;  %v2933_v63 = vor.u32 %v3693_v56, %v2930_v57  ;;  %v3657_v2 = vld [vmem:[#allocation5 + $0x284] sm:$0xf] }
  0x57   :  { %v3186_v1 = vld [vmem:[#allocation5 + $0x5b0] sm:$0xf0]  ;;  %v3061_v3 = vor.u32 %v3725_v58, %v3058_v59  ;;  %v3689_v5 = vld [vmem:[#allocation5 + $0x384] sm:$0xf] }
  0x58   :  { %1400 = vmatpush.bf16.msrb.mxu0 %v2977_v22  ;;  %v2786_v4 = vld [vmem:[#allocation5 + $0x290] sm:$0xf0]  ;;  %v3721_v7 = vld [vmem:[#allocation5 + $0x484] sm:$0xf]  ;;  %v3189_v10 = vor.u32 %v3757_v0, %v3186_v1  ;;  %v2584_v0 = vld [vmem:[#allocation5 + $0xe8] sm:$0xf] }
  0x59   :  { %1414 = vmatpush.bf16.msrb.mxu1 %v3105_v26  ;;  %v2914_v6 = vld [vmem:[#allocation5 + $0x390] sm:$0xf0]  ;;  %v2789_v11 = vor.u32 %v3657_v2, %v2786_v4  ;;  %v3753_v13 = vld [vmem:[#allocation5 + $0x584] sm:$0xf]  ;;  %v3608_v1 = vld [vmem:[#allocation5 + $0xf4] sm:$0xf0] }
  0x5a   :  { %1455 = vmatpush.bf16.msra.mxu2 %v2613_v21  ;;  %1442 = vmatpush.bf16.msrb.mxu3 %v2469_v27  ;;  %v3042_v9 = vld [vmem:[#allocation5 + $0x490] sm:$0xf0]  ;;  %v2917_v12 = vor.u32 %v3689_v5, %v2914_v6  ;;  %v3653_v15 = vld [vmem:[#allocation5 + $0x264] sm:$0xf]  ;;  %v2712_v2 = vld [vmem:[#allocation5 + $0x1e8] sm:$0xf] }
  0x5b   :  { %1401 = vmatmul.bf16.vlgmr.msrb.gmra.mxu0 %v4113_v37  ;;  %v3170_v14 = vld [vmem:[#allocation5 + $0x590] sm:$0xf0]  ;;  %v3045_v16 = vor.u32 %v3721_v7, %v3042_v9  ;;  %v3685_v18 = vld [vmem:[#allocation5 + $0x364] sm:$0xf]  ;;  %v3640_v4 = vld [vmem:[#allocation5 + $0x1f4] sm:$0xf0] }
  0x5c   :  { %1463 = vmatpush.bf16.msra.mxu0 %v2837_v31  ;;  %1415 = vmatmul.bf16.vlgmr.msrb.gmra.mxu1 %v4115_v42  ;;  %v2770_v17 = vld [vmem:[#allocation5 + $0x270] sm:$0xf0]  ;;  %v3717_v20 = vld [vmem:[#allocation5 + $0x464] sm:$0xf]  ;;  %v3173_v22 = vor.u32 %v3753_v13, %v3170_v14  ;;  %v2585_v13 = vor.u32 %v3608_v1, %v2584_v0  ;;  %v2968_v14 = vld [vmem:[#allocation5 + $0x3e8] sm:$0xf] }
  0x5d   :  { %1477 = vmatpush.bf16.msra.mxu1 %v2965_v32  ;;  %1443 = vmatmul.bf16.vlgmr.msrb.gmra.mxu3 %v4099_v55  ;;  %v2898_v19 = vld [vmem:[#allocation5 + $0x370] sm:$0xf0]  ;;  %v2773_v23 = vor.u32 %v3653_v15, %v2770_v17  ;;  %v3749_v25 = vld [vmem:[#allocation5 + $0x564] sm:$0xf]  ;;  %v3704_v15 = vld [vmem:[#allocation5 + $0x3f4] sm:$0xf0]  ;;  %v2713_v17 = vor.u32 %v3640_v4, %v2712_v2 }
  0x5e   :  { %1491 = vmatpush.bf16.msra.mxu3 %v3093_v36  ;;  %1456 = vmatpush.bf16.msra.mxu2 %v2597_v41  ;;  %v3026_v21 = vld [vmem:[#allocation5 + $0x470] sm:$0xf0]  ;;  %v2901_v24 = vor.u32 %v3685_v18, %v2898_v19  ;;  %v3649_v27 = vld [vmem:[#allocation5 + $0x244] sm:$0xf]  ;;  %v3604_v18 = vld [vmem:[#allocation5 + $0xd4] sm:$0xf0] }
  0x5f   :  { %v3154_v26 = vld [vmem:[#allocation5 + $0x570] sm:$0xf0]  ;;  %v3029_v28 = vor.u32 %v3717_v20, %v3026_v21  ;;  %v3681_v30 = vld [vmem:[#allocation5 + $0x344] sm:$0xf]  ;;  %v2840_v20 = vld [vmem:[#allocation5 + $0x2e8] sm:$0xf] }
  0x60   :  { %1464 = vmatpush.bf16.msra.mxu0 %v2821_v46  ;;  %v2754_v29 = vld [vmem:[#allocation5 + $0x250] sm:$0xf0]  ;;  %v3713_v32 = vld [vmem:[#allocation5 + $0x444] sm:$0xf]  ;;  %v3157_v34 = vor.u32 %v3749_v25, %v3154_v26  ;;  %v3672_v21 = vld [vmem:[#allocation5 + $0x2f4] sm:$0xf0]  ;;  %v2969_v25 = vor.u32 %v3704_v15, %v2968_v14 }
  0x61   :  { %1478 = vmatpush.bf16.msra.mxu1 %v2949_v47  ;;  %1457 = vmatmul.bf16.vlgmr.msra.gmra.mxu2 %v4105_v8  ;;  %v2882_v31 = vld [vmem:[#allocation5 + $0x350] sm:$0xf0]  ;;  %v2757_v35 = vor.u32 %v3649_v27, %v2754_v29  ;;  %v3745_v38 = vld [vmem:[#allocation5 + $0x544] sm:$0xf]  ;;  %v2952_v27 = vld [vmem:[#allocation5 + $0x3c8] sm:$0xf] }
  0x62   :  { %1505 = vmatpush.bf16.msrb.mxu2 %v3221_v45  ;;  %1492 = vmatpush.bf16.msra.mxu3 %v3077_v52  ;;  %v3010_v33 = vld [vmem:[#allocation5 + $0x450] sm:$0xf0]  ;;  %v2885_v36 = vor.u32 %v3681_v30, %v2882_v31  ;;  %v3645_v40 = vld [vmem:[#allocation5 + $0x224] sm:$0xf]  ;;  %v2552_v29 = vld [vmem:[#allocation5 + $0xa8] sm:$0xf]  ;;  %v2841_v30 = vor.u32 %v3672_v21, %v2840_v20 }
  0x63   :  { %v3138_v39 = vld [vmem:[#allocation5 + $0x550] sm:$0xf0]  ;;  %v3013_v41 = vor.u32 %v3713_v32, %v3010_v33  ;;  %v3677_v44 = vld [vmem:[#allocation5 + $0x324] sm:$0xf]  ;;  %v3600_v32 = vld [vmem:[#allocation5 + $0xb4] sm:$0xf0] }
  0x64   :  { %1465 = vmatpush.bf16.msra.mxu0 %v2805_v62  ;;  %v2738_v43 = vld [vmem:[#allocation5 + $0x230] sm:$0xf0]  ;;  %v3709_v46 = vld [vmem:[#allocation5 + $0x424] sm:$0xf]  ;;  %v3141_v48 = vor.u32 %v3745_v38, %v3138_v39  ;;  %v2824_v33 = vld [vmem:[#allocation5 + $0x2c8] sm:$0xf] }
  0x65   :  { %1479 = vmatpush.bf16.msra.mxu1 %v2933_v63  ;;  %v2866_v45 = vld [vmem:[#allocation5 + $0x330] sm:$0xf0]  ;;  %v3741_v49 = vld [vmem:[#allocation5 + $0x524] sm:$0xf]  ;;  %v2741_v52 = vor.u32 %v3645_v40, %v2738_v43  ;;  %v2936_v39 = vld [vmem:[#allocation5 + $0x3a8] sm:$0xf]  ;;  %v2553_v40 = vor.u32 %v3600_v32, %v2552_v29 }
  0x66   :  { %1506 = vmatpush.bf16.msrb.mxu2 %v3205_v61  ;;  %1493 = vmatpush.bf16.msra.mxu3 %v3061_v3  ;;  %v2994_v47 = vld [vmem:[#allocation5 + $0x430] sm:$0xf0]  ;;  %v2869_v53 = vor.u32 %v3677_v44, %v2866_v45  ;;  %v3641_v56 = vld [vmem:[#allocation5 + $0x204] sm:$0xf]  ;;  %v2536_v43 = vld [vmem:[#allocation5 + $0x88] sm:$0xf] }
  0x67   :  { %v3122_v51 = vld [vmem:[#allocation5 + $0x530] sm:$0xf0]  ;;  %v3673_v58 = vld [vmem:[#allocation5 + $0x304] sm:$0xf]  ;;  %v2997_v59 = vor.u32 %v3709_v46, %v2994_v47  ;;  %v3596_v44 = vld [vmem:[#allocation5 + $0x94] sm:$0xf0] }
  0x68   :  { %1466 = vmatpush.bf16.msra.mxu0 %v2789_v11  ;;  %v2722_v57 = vld [vmem:[#allocation5 + $0x210] sm:$0xf0]  ;;  %v3705_v62 = vld [vmem:[#allocation5 + $0x404] sm:$0xf]  ;;  %v3125_v3 = vor.u32 %v3741_v49, %v3122_v51  ;;  %v2808_v47 = vld [vmem:[#allocation5 + $0x2a8] sm:$0xf] }
  0x69   :  { %1480 = vmatpush.bf16.msra.mxu1 %v2917_v12  ;;  %v2850_v61 = vld [vmem:[#allocation5 + $0x310] sm:$0xf0]  ;;  %v3769_v5 = vld [vmem:[#allocation5 + $0x604] sm:$0xf]  ;;  %v2725_v7 = vor.u32 %v3641_v56, %v2722_v57  ;;  %v2664_v49 = vld [vmem:[#allocation5 + $0x188] sm:$0xf] }
  0x6a   :  { %1507 = vmatpush.bf16.msrb.mxu2 %v3189_v10  ;;  %1494 = vmatpush.bf16.msra.mxu3 %v3045_v16  ;;  %v2978_v63 = vld [vmem:[#allocation5 + $0x410] sm:$0xf0]  ;;  %v2853_v9 = vor.u32 %v3673_v58, %v2850_v61  ;;  %v3737_v10 = vld [vmem:[#allocation5 + $0x504] sm:$0xf]  ;;  %v2568_v16 = vld [vmem:[#allocation5 + $0xc8] sm:$0xf] }
  0x6b   :  { %v3234_v6 = vld [vmem:[#allocation5 + $0x610] sm:$0xf0]  ;;  %v2981_v12 = vor.u32 %v3705_v62, %v2978_v63  ;;  %v2569_v26 = vor.u32 %v3604_v18, %v2568_v16  ;;  %v3628_v51 = vld [vmem:[#allocation5 + $0x194] sm:$0xf0]  ;;  %v2920_v56 = vld [vmem:[#allocation5 + $0x388] sm:$0xf] }
  0x6c   :  { %1467 = vmatpush.bf16.msra.mxu0 %v2773_v23  ;;  %v3106_v11 = vld [vmem:[#allocation5 + $0x510] sm:$0xf0]  ;;  %v3237_v19 = vor.u32 %v3769_v5, %v3234_v6  ;;  %v2696_v23 = vld [vmem:[#allocation5 + $0x1c8] sm:$0xf]  ;;  %v3692_v57 = vld [vmem:[#allocation5 + $0x394] sm:$0xf0]  ;;  %v2665_v61 = vor.u32 %v3628_v51, %v2664_v49 }
  0x6d   :  { %1481 = vmatpush.bf16.msra.mxu1 %v2901_v24  ;;  %v3636_v24 = vld [vmem:[#allocation5 + $0x1d4] sm:$0xf0]  ;;  %v2520_v58 = vld [vmem:[#allocation5 + $0x68] sm:$0xf] }
  0x6e   :  { %1508 = vmatpush.bf16.msrb.mxu2 %v3173_v22  ;;  %1495 = vmatpush.bf16.msra.mxu3 %v3029_v28  ;;  %v3109_v22 = vor.u32 %v3737_v10, %v3106_v11  ;;  %v3700_v28 = vld [vmem:[#allocation5 + $0x3d4] sm:$0xf0]  ;;  %v2697_v31 = vor.u32 %v3636_v24, %v2696_v23  ;;  %v2792_v63 = vld [vmem:[#allocation5 + $0x288] sm:$0xf] }
  0x6f   :  { %v2953_v38 = vor.u32 %v3700_v28, %v2952_v27  ;;  %v3592_v62 = vld [vmem:[#allocation5 + $0x74] sm:$0xf0]  ;;  %v2648_v1 = vld [vmem:[#allocation5 + $0x168] sm:$0xf] }
  0x70   :  { %1468 = vmatpush.bf16.msra.mxu0 %v2757_v35  ;;  %v2680_v35 = vld [vmem:[#allocation5 + $0x1a8] sm:$0xf]  ;;  %v3660_v0 = vld [vmem:[#allocation5 + $0x294] sm:$0xf0]  ;;  %v2521_v4 = vor.u32 %v3592_v62, %v2520_v58 }
  0x71   :  { %1482 = vmatpush.bf16.msra.mxu1 %v2885_v36  ;;  %v3632_v36 = vld [vmem:[#allocation5 + $0x1b4] sm:$0xf0]  ;;  %v2904_v5 = vld [vmem:[#allocation5 + $0x368] sm:$0xf] }
  0x72   :  { %1509 = vmatpush.bf16.msrb.mxu2 %v3157_v34  ;;  %1496 = vmatpush.bf16.msra.mxu3 %v3013_v41  ;;  %v3668_v34 = vld [vmem:[#allocation5 + $0x2d4] sm:$0xf0]  ;;  %v2681_v46 = vor.u32 %v3632_v36, %v2680_v35  ;;  %v2632_v14 = vld [vmem:[#allocation5 + $0x148] sm:$0xf] }
  0x73   :  { %v3696_v41 = vld [vmem:[#allocation5 + $0x3b4] sm:$0xf0]  ;;  %v2825_v45 = vor.u32 %v3668_v34, %v2824_v33  ;;  %v2888_v18 = vld [vmem:[#allocation5 + $0x348] sm:$0xf] }
  0x74   :  { %1469 = vmatpush.bf16.msra.mxu0 %v2741_v52  ;;  %v2937_v52 = vor.u32 %v3696_v41, %v2936_v39  ;;  %v3624_v2 = vld [vmem:[#allocation5 + $0x174] sm:$0xf0]  ;;  %v2488_v20 = vld [vmem:[#allocation5 + $0x28] sm:$0xf] }
  0x75   :  { %1483 = vmatpush.bf16.msra.mxu1 %v2869_v53  ;;  %v2537_v53 = vor.u32 %v3596_v44, %v2536_v43  ;;  %v3688_v6 = vld [vmem:[#allocation5 + $0x374] sm:$0xf0]  ;;  %v2649_v10 = vor.u32 %v3624_v2, %v2648_v1  ;;  %v2760_v24 = vld [vmem:[#allocation5 + $0x248] sm:$0xf] }
  0x76   :  { %1510 = vmatpush.bf16.msrb.mxu2 %v3141_v48  ;;  %1497 = vmatpush.bf16.msra.mxu3 %v2997_v59  ;;  %v3664_v48 = vld [vmem:[#allocation5 + $0x2b4] sm:$0xf0]  ;;  %v2905_v16 = vor.u32 %v3688_v6, %v2904_v5  ;;  %v2872_v29 = vld [vmem:[#allocation5 + $0x328] sm:$0xf] }
  0x77   :  { %v2809_v59 = vor.u32 %v3664_v48, %v2808_v47  ;;  %v3588_v11 = vld [vmem:[#allocation5 + $0x54] sm:$0xf0]  ;;  %v2472_v32 = vld [vmem:[#allocation5 + $0x8] sm:$0xf] }
  0x78   :  { %1470 = vmatpush.bf16.msra.mxu0 %v2725_v7  ;;  %v2504_v7 = vld [vmem:[#allocation5 + $0x48] sm:$0xf]  ;;  %v3620_v15 = vld [vmem:[#allocation5 + $0x154] sm:$0xf0] }
  0x79   :  { %1484 = vmatpush.bf16.msra.mxu1 %v2853_v9  ;;  %v2793_v9 = vor.u32 %v3660_v0, %v2792_v63  ;;  %v3584_v23 = vld [vmem:[#allocation5 + $0x34] sm:$0xf0]  ;;  %v2600_v36 = vld [vmem:[#allocation5 + $0x108] sm:$0xf] }
  0x7a   :  { %1511 = vmatpush.bf16.msrb.mxu2 %v3125_v3  ;;  %1498 = vmatpush.bf16.msra.mxu3 %v2981_v12  ;;  %v2921_v3 = vor.u32 %v3692_v57, %v2920_v56  ;;  %v2776_v12 = vld [vmem:[#allocation5 + $0x268] sm:$0xf]  ;;  %v3616_v27 = vld [vmem:[#allocation5 + $0x134] sm:$0xf0]  ;;  %v2586_v57 = vld [vmem:[#allocation5 + $0xf8] sm:$0xf0] }
  0x7b   :  { %1471 = vmatmul.bf16.vlgmr.msra.gmra.mxu0 %v4097_v54  ;;  %v3580_v33 = vld [vmem:[#allocation5 + $0x14] sm:$0xf0]  ;;  %v3096_v41 = vld [vmem:[#allocation5 + $0x4e8] sm:$0xf] }
  0x7c   :  { %1526 = vmatpush.bf16.msrb.mxu0 %v3237_v19  ;;  %1485 = vmatmul.bf16.vlgmr.msra.gmra.mxu1 %v4101_v60  ;;  %v3684_v19 = vld [vmem:[#allocation5 + $0x354] sm:$0xf0]  ;;  %v2473_v47 = vor.u32 %v3580_v33, %v2472_v32  ;;  %v2856_v48 = vld [vmem:[#allocation5 + $0x308] sm:$0xf]  ;;  %v3594_v33 = vld [vmem:[#allocation5 + $0x8c] sm:$0xf] }
  0x7d   :  { %1533 = vmatpush.bf16.msrb.mxu1 %v2585_v13  ;;  %1499 = vmatmul.bf16.vlgmr.msra.gmra.mxu3 %v4113_v37  ;;  %v3656_v13 = vld [vmem:[#allocation5 + $0x274] sm:$0xf0]  ;;  %v2889_v28 = vor.u32 %v3684_v19, %v2888_v18  ;;  %v3080_v58 = vld [vmem:[#allocation5 + $0x4c8] sm:$0xf] }
  0x7e   :  { %1547 = vmatpush.bf16.msrb.mxu3 %v2713_v17  ;;  %1512 = vmatpush.bf16.msrb.mxu2 %v3109_v22  ;;  %v2505_v17 = vor.u32 %v3588_v11, %v2504_v7  ;;  %v2777_v21 = vor.u32 %v3656_v13, %v2776_v12  ;;  %v2633_v22 = vor.u32 %v3620_v15, %v2632_v14  ;;  %v3648_v39 = vld [vmem:[#allocation5 + $0x234] sm:$0xf0]  ;;  %v3208_v62 = vld [vmem:[#allocation5 + $0x5c8] sm:$0xf]  ;;  %v3638_v15 = vld [vmem:[#allocation5 + $0x1ec] sm:$0xf] }
  0x7f   :  { %v3736_v43 = vld [vmem:[#allocation5 + $0x4f4] sm:$0xf0]  ;;  %v2728_v63 = vld [vmem:[#allocation5 + $0x208] sm:$0xf] }
  0x80   :  { %1561 = vmatpush.bf16.msra.mxu0 %v2841_v30  ;;  %v2489_v30 = vor.u32 %v3584_v23, %v2488_v20  ;;  %v3676_v49 = vld [vmem:[#allocation5 + $0x314] sm:$0xf0]  ;;  %v3097_v56 = vor.u32 %v3736_v43, %v3096_v41  ;;  %v3064_v11 = vld [vmem:[#allocation5 + $0x4a8] sm:$0xf]  ;;  %v2682_v41 = vld [vmem:[#allocation5 + $0x1b8] sm:$0xf0] }
  0x81   :  { %1534 = vmatpush.bf16.msrb.mxu1 %v2569_v26  ;;  %1513 = vmatmul.bf16.vlgmr.msrb.gmra.mxu2 %v4115_v42  ;;  %v2616_v26 = vld [vmem:[#allocation5 + $0x128] sm:$0xf]  ;;  %v3644_v0 = vld [vmem:[#allocation5 + $0x214] sm:$0xf0]  ;;  %v2857_v1 = vor.u32 %v3676_v49, %v2856_v48  ;;  %v2522_v48 = vld [vmem:[#allocation5 + $0x78] sm:$0xf0] }
  0x82   :  { %1575 = vmatpush.bf16.msra.mxu2 %v2969_v25  ;;  %1548 = vmatpush.bf16.msrb.mxu3 %v2697_v31  ;;  %v3652_v25 = vld [vmem:[#allocation5 + $0x254] sm:$0xf0]  ;;  %v2617_v35 = vor.u32 %v3616_v27, %v2616_v26  ;;  %v2729_v7 = vor.u32 %v3644_v0, %v2728_v63  ;;  %v3634_v27 = vld [vmem:[#allocation5 + $0x1cc] sm:$0xf]  ;;  %v3160_v43 = vld [vmem:[#allocation5 + $0x568] sm:$0xf] }
  0x83   :  { %v3680_v31 = vld [vmem:[#allocation5 + $0x334] sm:$0xf0]  ;;  %v2761_v34 = vor.u32 %v3652_v25, %v2760_v24  ;;  %v3048_v24 = vld [vmem:[#allocation5 + $0x488] sm:$0xf]  ;;  %v3586_v63 = vld [vmem:[#allocation5 + $0x4c] sm:$0xf] }
  0x84   :  { %1562 = vmatpush.bf16.msra.mxu0 %v2825_v45  ;;  %v2873_v44 = vor.u32 %v3680_v31, %v2872_v29  ;;  %v3224_v45 = vld [vmem:[#allocation5 + $0x5e8] sm:$0xf]  ;;  %v3764_v2 = vld [vmem:[#allocation5 + $0x5d4] sm:$0xf0]  ;;  %v2506_v0 = vld [vmem:[#allocation5 + $0x58] sm:$0xf0] }
  0x85   :  { %1535 = vmatpush.bf16.msrb.mxu1 %v2553_v40  ;;  %v3612_v40 = vld [vmem:[#allocation5 + $0x114] sm:$0xf0]  ;;  %v3209_v12 = vor.u32 %v3764_v2, %v3208_v62  ;;  %v3176_v29 = vld [vmem:[#allocation5 + $0x588] sm:$0xf] }
  0x86   :  { %1576 = vmatpush.bf16.msra.mxu2 %v2953_v38  ;;  %1549 = vmatpush.bf16.msrb.mxu3 %v2681_v46  ;;  %v2744_v38 = vld [vmem:[#allocation5 + $0x228] sm:$0xf]  ;;  %v3768_v46 = vld [vmem:[#allocation5 + $0x5f4] sm:$0xf0] }
  0x87   :  { %v2745_v51 = vor.u32 %v3648_v39, %v2744_v38  ;;  %v3728_v13 = vld [vmem:[#allocation5 + $0x4b4] sm:$0xf0]  ;;  %v3000_v2 = vld [vmem:[#allocation5 + $0x428] sm:$0xf] }
  0x88   :  { %1563 = vmatpush.bf16.msra.mxu0 %v2809_v59  ;;  %v3732_v59 = vld [vmem:[#allocation5 + $0x4d4] sm:$0xf0]  ;;  %v3065_v20 = vor.u32 %v3728_v13, %v3064_v11  ;;  %v3582_v11 = vld [vmem:[#allocation5 + $0x2c] sm:$0xf]  ;;  %v2490_v13 = vld [vmem:[#allocation5 + $0x38] sm:$0xf0] }
  0x89   :  { %1536 = vmatpush.bf16.msrb.mxu1 %v2537_v53  ;;  %v2601_v53 = vor.u32 %v3612_v40, %v2600_v36  ;;  %v3081_v6 = vor.u32 %v3732_v59, %v3080_v58  ;;  %v3760_v18 = vld [vmem:[#allocation5 + $0x5b4] sm:$0xf0]  ;;  %v3032_v36 = vld [vmem:[#allocation5 + $0x468] sm:$0xf]  ;;  %v3630_v40 = vld [vmem:[#allocation5 + $0x1ac] sm:$0xf] }
  0x8a   :  { %1577 = vmatpush.bf16.msra.mxu2 %v2937_v52  ;;  %1550 = vmatpush.bf16.msrb.mxu3 %v2665_v61  ;;  %v3606_v52 = vld [vmem:[#allocation5 + $0xec] sm:$0xf]  ;;  %v3225_v61 = vor.u32 %v3768_v46, %v3224_v45  ;;  %v3724_v26 = vld [vmem:[#allocation5 + $0x494] sm:$0xf0]  ;;  %v2685_v49 = vor.u32 %v3630_v40, %v2682_v41  ;;  %v3144_v58 = vld [vmem:[#allocation5 + $0x548] sm:$0xf] }
  0x8b   :  { %3247 = vmatmul.msk.bf16.vlgmr.msrb.gmra.mxu0 %vm1333_vm0, %v4109_v50  ;;  %v2589_v5 = vor.u32 %v3606_v52, %v2586_v57  ;;  %v3049_v32 = vor.u32 %v3724_v26, %v3048_v24  ;;  %v3720_v39 = vld [vmem:[#allocation5 + $0x474] sm:$0xf0]  ;;  %v2666_v57 = vld [vmem:[#allocation5 + $0x198] sm:$0xf0]  ;;  %v2493_v24 = vor.u32 %v3582_v11, %v2490_v13  ;;  %v3762_v11 = vld [vmem:[#allocation5 + $0x5cc] sm:$0xf] }
  0x8c   :  { %1564 = vmatpush.bf16.msra.mxu0 %v2793_v9  ;;  %v3602_v9 = vld [vmem:[#allocation5 + $0xcc] sm:$0xf]  ;;  %v3033_v46 = vor.u32 %v3720_v39, %v3032_v36  ;;  %v3748_v59 = vld [vmem:[#allocation5 + $0x554] sm:$0xf0]  ;;  %v2970_v26 = vld [vmem:[#allocation5 + $0x3f8] sm:$0xf0] }
  0x8d   :  { %1537 = vmatpush.bf16.msrb.mxu1 %v2521_v4  ;;  %v3772_v4 = vld [vmem:[#allocation5 + $0x614] sm:$0xf0]  ;;  %v3614_v39 = vld [vmem:[#allocation5 + $0x12c] sm:$0xf]  ;;  %v2618_v40 = vld [vmem:[#allocation5 + $0x138] sm:$0xf0] }
  0x8e   :  { %1578 = vmatpush.bf16.msra.mxu2 %v2921_v3  ;;  %1551 = vmatpush.bf16.msrb.mxu3 %v2649_v10  ;;  %v3240_v3 = vld [vmem:[#allocation5 + $0x608] sm:$0xf]  ;;  %v2570_v10 = vld [vmem:[#allocation5 + $0xd8] sm:$0xf0] }
  0x8f   :  { %v3241_v14 = vor.u32 %v3772_v4, %v3240_v3  ;;  %v2573_v19 = vor.u32 %v3602_v9, %v2570_v10  ;;  %v3145_v3 = vor.u32 %v3748_v59, %v3144_v58  ;;  %v3712_v4 = vld [vmem:[#allocation5 + $0x434] sm:$0xf0]  ;;  %v2509_v10 = vor.u32 %v3586_v63, %v2506_v0  ;;  %v2602_v58 = vld [vmem:[#allocation5 + $0x118] sm:$0xf0] }
  0x90   :  { %1565 = vmatpush.bf16.msra.mxu0 %v2777_v21  ;;  %v3598_v21 = vld [vmem:[#allocation5 + $0xac] sm:$0xf]  ;;  %v3744_v9 = vld [vmem:[#allocation5 + $0x534] sm:$0xf0]  ;;  %v2938_v59 = vld [vmem:[#allocation5 + $0x3b8] sm:$0xf0] }
  0x91   :  { %1538 = vmatpush.bf16.msrb.mxu1 %v2505_v17  ;;  %v3192_v17 = vld [vmem:[#allocation5 + $0x5a8] sm:$0xf] }
  0x92   :  { %1579 = vmatpush.bf16.msra.mxu2 %v2905_v16  ;;  %1552 = vmatpush.bf16.msrb.mxu3 %v2633_v22  ;;  %v2714_v16 = vld [vmem:[#allocation5 + $0x1f8] sm:$0xf0]  ;;  %v3193_v25 = vor.u32 %v3760_v18, %v3192_v17  ;;  %v3112_v18 = vld [vmem:[#allocation5 + $0x508] sm:$0xf] }
  0x93   :  { %v2554_v22 = vld [vmem:[#allocation5 + $0xb8] sm:$0xf0]  ;;  %v2717_v23 = vor.u32 %v3638_v15, %v2714_v16  ;;  %v2984_v15 = vld [vmem:[#allocation5 + $0x408] sm:$0xf]  ;;  %v3708_v16 = vld [vmem:[#allocation5 + $0x414] sm:$0xf0] }
  0x94   :  { %1566 = vmatpush.bf16.msra.mxu0 %v2761_v34  ;;  %v2557_v31 = vor.u32 %v3598_v21, %v2554_v22  ;;  %v2538_v34 = vld [vmem:[#allocation5 + $0x98] sm:$0xf0]  ;;  %v3740_v21 = vld [vmem:[#allocation5 + $0x514] sm:$0xf0]  ;;  %v3670_v22 = vld [vmem:[#allocation5 + $0x2ec] sm:$0xf] }
  0x95   :  { %1539 = vmatpush.bf16.msrb.mxu1 %v2489_v30  ;;  %v3756_v30 = vld [vmem:[#allocation5 + $0x594] sm:$0xf0]  ;;  %v2541_v45 = vor.u32 %v3594_v33, %v2538_v34  ;;  %v3734_v33 = vld [vmem:[#allocation5 + $0x4ec] sm:$0xf]  ;;  %v3098_v34 = vld [vmem:[#allocation5 + $0x4f8] sm:$0xf0] }
  0x96   :  { %1580 = vmatpush.bf16.msra.mxu2 %v2889_v28  ;;  %1553 = vmatpush.bf16.msrb.mxu3 %v2617_v35  ;;  %v2698_v28 = vld [vmem:[#allocation5 + $0x1d8] sm:$0xf0]  ;;  %v3177_v38 = vor.u32 %v3756_v30, %v3176_v29 }
  0x97   :  { %v2701_v35 = vor.u32 %v3634_v27, %v2698_v28  ;;  %v2985_v27 = vor.u32 %v3708_v16, %v2984_v15  ;;  %v3578_v28 = vld [vmem:[#allocation5 + $0xc] sm:$0xf]  ;;  %v2474_v29 = vld [vmem:[#allocation5 + $0x18] sm:$0xf0] }
  0x98   :  { %1567 = vmatpush.bf16.msra.mxu0 %v2745_v51  ;;  %v3016_v51 = vld [vmem:[#allocation5 + $0x448] sm:$0xf]  ;;  %v2477_v41 = vor.u32 %v3578_v28, %v2474_v29  ;;  %v3722_v15 = vld [vmem:[#allocation5 + $0x48c] sm:$0xf]  ;;  %v3050_v16 = vld [vmem:[#allocation5 + $0x498] sm:$0xf0] }
  0x99   :  { %1540 = vmatpush.bf16.msrb.mxu1 %v2473_v47  ;;  %v3590_v47 = vld [vmem:[#allocation5 + $0x6c] sm:$0xf] }
  0x9a   :  { %1581 = vmatpush.bf16.msra.mxu2 %v2873_v44  ;;  %1554 = vmatpush.bf16.msrb.mxu3 %v2601_v53  ;;  %v3752_v44 = vld [vmem:[#allocation5 + $0x574] sm:$0xf0] }
  0x9b   :  { %v3161_v52 = vor.u32 %v3752_v44, %v3160_v43  ;;  %v3716_v53 = vld [vmem:[#allocation5 + $0x454] sm:$0xf0]  ;;  %v3698_v43 = vld [vmem:[#allocation5 + $0x3cc] sm:$0xf]  ;;  %v2954_v44 = vld [vmem:[#allocation5 + $0x3d8] sm:$0xf0] }
  0x9c   :  { %1541 = vmatmul.bf16.vlgmr.msrb.gmra.mxu1 %v4099_v55  ;;  %1568 = vmatpush.bf16.msra.mxu0 %v2729_v7  ;;  %v3017_v62 = vor.u32 %v3716_v53, %v3016_v51  ;;  %v3128_v7 = vld [vmem:[#allocation5 + $0x528] sm:$0xf]  ;;  %v3662_v51 = vld [vmem:[#allocation5 + $0x2ac] sm:$0xf]  ;;  %v2957_v53 = vor.u32 %v3698_v43, %v2954_v44  ;;  %v2746_v44 = vld [vmem:[#allocation5 + $0x238] sm:$0xf0] }
  0x9d   :  { %1589 = vmatpush.bf16.msra.mxu1 %v3097_v56  ;;  %1555 = vmatmul.bf16.vlgmr.msrb.gmra.mxu3 %v4105_v8  ;;  %v3626_v56 = vld [vmem:[#allocation5 + $0x18c] sm:$0xf]  ;;  %v3129_v17 = vor.u32 %v3744_v9, %v3128_v7  ;;  %v2794_v7 = vld [vmem:[#allocation5 + $0x298] sm:$0xf0] }
  0x9e   :  { %1603 = vmatpush.bf16.msra.mxu3 %v3225_v61  ;;  %1582 = vmatpush.bf16.msra.mxu2 %v2857_v1  ;;  %v2525_v61 = vor.u32 %v3590_v47, %v2522_v48  ;;  %v2669_v1 = vor.u32 %v3626_v56, %v2666_v57  ;;  %v2621_v48 = vor.u32 %v3614_v39, %v2618_v40  ;;  %v3694_v56 = vld [vmem:[#allocation5 + $0x3ac] sm:$0xf] }
  0x9f   :  { %1569 = vmatmul.bf16.vlgmr.msra.gmra.mxu0 %v4097_v54  ;;  %v3610_v57 = vld [vmem:[#allocation5 + $0x10c] sm:$0xf] }
  0xa0   :  { %1624 = vmatpush.bf16.msrb.mxu0 %v3241_v14  ;;  %v3690_v9 = vld [vmem:[#allocation5 + $0x38c] sm:$0xf] }
  0xa1   :  { %1590 = vmatpush.bf16.msra.mxu1 %v3081_v6  ;;  %1583 = vmatmul.bf16.vlgmr.msra.gmra.mxu2 %v4101_v60  ;;  %v2650_v6 = vld [vmem:[#allocation5 + $0x178] sm:$0xf0]  ;;  %v3714_v39 = vld [vmem:[#allocation5 + $0x44c] sm:$0xf] }
  0xa2   :  { %1631 = vmatpush.bf16.msrb.mxu2 %v2589_v5  ;;  %1604 = vmatpush.bf16.msra.mxu3 %v3209_v12  ;;  %v3622_v5 = vld [vmem:[#allocation5 + $0x16c] sm:$0xf]  ;;  %v3001_v12 = vor.u32 %v3712_v4, %v3000_v2  ;;  %v2941_v4 = vor.u32 %v3694_v56, %v2938_v59  ;;  %v3002_v56 = vld [vmem:[#allocation5 + $0x438] sm:$0xf0] }
  0xa3   :  { %v2653_v14 = vor.u32 %v3622_v5, %v2650_v6  ;;  %v3726_v2 = vld [vmem:[#allocation5 + $0x4ac] sm:$0xf] }
  0xa4   :  { %1645 = vmatpush.bf16.msra.mxu0 %v2717_v23  ;;  %v2842_v23 = vld [vmem:[#allocation5 + $0x2f8] sm:$0xf0]  ;;  %v3658_v6 = vld [vmem:[#allocation5 + $0x28c] sm:$0xf] }
  0xa5   :  { %1591 = vmatpush.bf16.msra.mxu1 %v3065_v20  ;;  %v2634_v20 = vld [vmem:[#allocation5 + $0x158] sm:$0xf0]  ;;  %v3646_v43 = vld [vmem:[#allocation5 + $0x22c] sm:$0xf] }
  0xa6   :  { %1632 = vmatpush.bf16.msrb.mxu2 %v2573_v19  ;;  %1605 = vmatpush.bf16.msra.mxu3 %v3193_v25  ;;  %v3618_v19 = vld [vmem:[#allocation5 + $0x14c] sm:$0xf] }
  0xa7   :  { %v3702_v25 = vld [vmem:[#allocation5 + $0x3ec] sm:$0xf]  ;;  %v2637_v30 = vor.u32 %v3618_v19, %v2634_v20 }
  0xa8   :  { %1646 = vmatpush.bf16.msra.mxu0 %v2701_v35  ;;  %v3666_v35 = vld [vmem:[#allocation5 + $0x2cc] sm:$0xf]  ;;  %v2973_v36 = vor.u32 %v3702_v25, %v2970_v26 }
  0xa9   :  { %1592 = vmatpush.bf16.msra.mxu1 %v3049_v32  ;;  %v2845_v32 = vor.u32 %v3670_v22, %v2842_v23  ;;  %v3654_v19 = vld [vmem:[#allocation5 + $0x26c] sm:$0xf]  ;;  %v3194_v23 = vld [vmem:[#allocation5 + $0x5b8] sm:$0xf0] }
  0xaa   :  { %1633 = vmatpush.bf16.msrb.mxu2 %v2557_v31  ;;  %1606 = vmatpush.bf16.msra.mxu3 %v3177_v38  ;;  %v3113_v31 = vor.u32 %v3740_v21, %v3112_v18  ;;  %v2826_v38 = vld [vmem:[#allocation5 + $0x2d8] sm:$0xf0]  ;;  %v3686_v20 = vld [vmem:[#allocation5 + $0x36c] sm:$0xf] }
  0xab   :  { %v2829_v47 = vor.u32 %v3666_v35, %v2826_v38  ;;  %v2906_v21 = vld [vmem:[#allocation5 + $0x378] sm:$0xf0]  ;;  %v3758_v22 = vld [vmem:[#allocation5 + $0x5ac] sm:$0xf] }
  0xac   :  { %1647 = vmatpush.bf16.msra.mxu0 %v2685_v49  ;;  %v3082_v49 = vld [vmem:[#allocation5 + $0x4d8] sm:$0xf0]  ;;  %v3718_v26 = vld [vmem:[#allocation5 + $0x46c] sm:$0xf]  ;;  %v2909_v28 = vor.u32 %v3686_v20, %v2906_v21  ;;  %v3197_v29 = vor.u32 %v3758_v22, %v3194_v23  ;;  %v3300_v23 = vld [vmem:[#allocation8 + $0x60] sm:$0xf] }
  0xad   :  { %1593 = vmatpush.bf16.msra.mxu1 %v3033_v46  ;;  %v3730_v46 = vld [vmem:[#allocation5 + $0x4cc] sm:$0xf]  ;;  %v3178_v35 = vld [vmem:[#allocation5 + $0x598] sm:$0xf0] }
  0xae   :  { %1634 = vmatpush.bf16.msrb.mxu2 %v2541_v45  ;;  %1607 = vmatpush.bf16.msra.mxu3 %v3161_v52  ;;  %v3101_v45 = vor.u32 %v3734_v33, %v3098_v34  ;;  %v2810_v52 = vld [vmem:[#allocation5 + $0x2b8] sm:$0xf0]  ;;  %v3085_v63 = vor.u32 %v3730_v46, %v3082_v49  ;;  %v3754_v34 = vld [vmem:[#allocation5 + $0x58c] sm:$0xf] }
  0xaf   :  { %3248 = vmatmul.msk.bf16.vlgmr.msrb.gmra.mxu0 %vm1333_vm0, %v4109_v50  ;;  %v2813_v0 = vor.u32 %v3662_v51, %v2810_v52  ;;  %v2890_v33 = vld [vmem:[#allocation5 + $0x358] sm:$0xf0]  ;;  %v4137_v51 = vld [vmem:[#allocation7] sm:$0xf]  ;;  %v2749_v52 = vor.u32 %v3646_v43, %v2746_v44 }
  0xb0   :  { %1648 = vmatpush.bf16.msra.mxu0 %v2669_v1  ;;  %v2605_v1 = vor.u32 %v3610_v57, %v2602_v58  ;;  %v2874_v46 = vld [vmem:[#allocation5 + $0x338] sm:$0xf0]  ;;  %v3642_v57 = vld [vmem:[#allocation5 + $0x20c] sm:$0xf] }
  0xb1   :  { %1594 = vmatpush.bf16.msra.mxu1 %v3017_v62  ;;  %v3226_v62 = vld [vmem:[#allocation5 + $0x5f8] sm:$0xf0] }
  0xb2   :  { %1635 = vmatpush.bf16.msrb.mxu2 %v2525_v61  ;;  %1608 = vmatpush.bf16.msra.mxu3 %v3145_v3  ;;  %v3766_v61 = vld [vmem:[#allocation5 + $0x5ec] sm:$0xf]  ;;  %v3066_v3 = vld [vmem:[#allocation5 + $0x4b8] sm:$0xf0] }
  0xb3   :  { %v3229_v5 = vor.u32 %v3766_v61, %v3226_v62  ;;  %v3069_v13 = vor.u32 %v3726_v2, %v3066_v3  ;;  %v2730_v62 = vld [vmem:[#allocation5 + $0x218] sm:$0xf0]  ;;  %v3308_v2 = vld [vmem:[#allocation8 + $0x70] sm:$0xf]  ;;  %v3746_v3 = vld [vmem:[#allocation5 + $0x54c] sm:$0xf] }
  0xb4   :  { %1649 = vmatpush.bf16.msra.mxu0 %v2653_v14  ;;  %v2797_v14 = vor.u32 %v3658_v6, %v2794_v7  ;;  %v3788_v7 = vld [vmem:[#allocation8 + $0x74] sm:$0xf0] }
  0xb5   :  { %1595 = vmatpush.bf16.msra.mxu1 %v3001_v12  ;;  %v3210_v12 = vld [vmem:[#allocation5 + $0x5d8] sm:$0xf0] }
  0xb6   :  { %1636 = vmatpush.bf16.msrb.mxu2 %v2509_v10  ;;  %1609 = vmatpush.bf16.msra.mxu3 %v3129_v17  ;;  %v2922_v10 = vld [vmem:[#allocation5 + $0x398] sm:$0xf0]  ;;  %v3213_v18 = vor.u32 %v3762_v11, %v3210_v12  ;;  %v2733_v11 = vor.u32 %v3642_v57, %v2730_v62  ;;  %v3706_v12 = vld [vmem:[#allocation5 + $0x40c] sm:$0xf] }
  0xb7   :  { %v2925_v17 = vor.u32 %v3690_v9, %v2922_v10  ;;  %v1346_v58 = vpop.f32.mrf.mxu0  ;;  %v3372_v9 = vld [vmem:[#allocation8 + $0xf0] sm:$0xf]  ;;  %v3804_v10 = vld [vmem:[#allocation8 + $0xf4] sm:$0xf0] }
  0xb8   :  { %1650 = vmatpush.bf16.msra.mxu0 %v2637_v30  ;;  %v3650_v30 = vld [vmem:[#allocation5 + $0x24c] sm:$0xf]  ;;  %v3130_v20 = vld [vmem:[#allocation5 + $0x538] sm:$0xf0]  ;;  %v3373_v21 = vor.u32 %v3804_v10, %v3372_v9  ;;  %v3332_v10 = vld [vmem:[#allocation8 + $0xa0] sm:$0xf] }
  0xb9   :  { %1596 = vmatpush.bf16.msra.mxu1 %v2985_v27  ;;  %v3034_v27 = vld [vmem:[#allocation5 + $0x478] sm:$0xf0] }
  0xba   :  { %1637 = vmatpush.bf16.msrb.mxu2 %v2493_v24  ;;  %1610 = vmatpush.bf16.msra.mxu3 %v3113_v31  ;;  %v3053_v24 = vor.u32 %v3722_v15, %v3050_v16  ;;  %v2762_v31 = vld [vmem:[#allocation5 + $0x258] sm:$0xf0] }
  0xbb   :  { %v2765_v38 = vor.u32 %v3650_v30, %v2762_v31  ;;  %v3738_v31 = vld [vmem:[#allocation5 + $0x50c] sm:$0xf] }
  0xbc   :  { %1597 = vmatmul.bf16.vlgmr.msra.gmra.mxu1 %v4113_v37  ;;  %1651 = vmatpush.bf16.msra.mxu0 %v2621_v48  ;;  %v3162_v48 = vld [vmem:[#allocation5 + $0x578] sm:$0xf0] }
  0xbd   :  { %1659 = vmatpush.bf16.msrb.mxu1 %v2845_v32  ;;  %1611 = vmatmul.bf16.vlgmr.msra.gmra.mxu3 %v4115_v42  ;;  %v3682_v32 = vld [vmem:[#allocation5 + $0x34c] sm:$0xf] }
  0xbe   :  { %1673 = vmatpush.bf16.msrb.mxu3 %v2973_v36  ;;  %1638 = vmatpush.bf16.msrb.mxu2 %v2477_v41  ;;  %v3037_v36 = vor.u32 %v3718_v26, %v3034_v27  ;;  %v2893_v40 = vor.u32 %v3682_v32, %v2890_v33  ;;  %v3181_v41 = vor.u32 %v3754_v34, %v3178_v35  ;;  %v3364_v26 = vld [vmem:[#allocation8 + $0xe0] sm:$0xf]  ;;  %v3802_v27 = vld [vmem:[#allocation8 + $0xe4] sm:$0xf0]  ;;  %v3114_v32 = vld [vmem:[#allocation5 + $0x518] sm:$0xf0] }
  0xbf   :  { %v1348_v33 = vpop.f32.mrf.mxu0  ;;  %v3292_v34 = vld [vmem:[#allocation8 + $0x50] sm:$0xf]  ;;  %v3784_v35 = vld [vmem:[#allocation8 + $0x54] sm:$0xf0]  ;;  %v3117_v44 = vor.u32 %v3738_v31, %v3114_v32  ;;  %v3316_v31 = vld [vmem:[#allocation8 + $0x80] sm:$0xf] }
  0xc0   :  { %1652 = vmatpush.bf16.msra.mxu0 %v2605_v1  ;;  %v1360_v1 = vpop.f32.mrf.mxu1  ;;  %v3790_v32 = vld [vmem:[#allocation8 + $0x84] sm:$0xf0] }
  0xc1   :  { %1660 = vmatpush.bf16.msrb.mxu1 %v2829_v47  ;;  %1639 = vmatmul.bf16.vlgmr.msrb.gmra.mxu2 %v4099_v55  ;;  %v2778_v55 = vld [vmem:[#allocation5 + $0x278] sm:$0xf0]  ;;  %v3750_v47 = vld [vmem:[#allocation5 + $0x56c] sm:$0xf] }
  0xc2   :  { %1687 = vmatpush.bf16.msra.mxu2 %v3101_v45  ;;  %1674 = vmatpush.bf16.msrb.mxu3 %v2957_v53  ;;  %v2781_v25 = vor.u32 %v3654_v19, %v2778_v55  ;;  %v3678_v45 = vld [vmem:[#allocation5 + $0x32c] sm:$0xf]  ;;  %v3165_v61 = vor.u32 %v3750_v47, %v3162_v48  ;;  %v3309_v19 = vor.u32 %v3788_v7, %v3308_v2 }
  0xc3   :  { %1653 = vmatmul.bf16.vlgmr.msra.gmra.mxu0 %v4105_v8  ;;  %v3018_v8 = vld [vmem:[#allocation5 + $0x458] sm:$0xf0]  ;;  %v3710_v53 = vld [vmem:[#allocation5 + $0x42c] sm:$0xf]  ;;  %v2877_v59 = vor.u32 %v3678_v45, %v2874_v46  ;;  %v3284_v46 = vld [vmem:[#allocation8 + $0x40] sm:$0xf] }
  0xc4   :  { %1701 = vmatpush.bf16.msrb.mxu0 %v3229_v5  ;;  %v3021_v49 = vor.u32 %v3714_v39, %v3018_v8  ;;  %v4139_v5 = vpop.f32.mrf.mxu2  ;;  %v3005_v6 = vor.u32 %v3710_v53, %v3002_v56  ;;  %v3742_v55 = vld [vmem:[#allocation5 + $0x52c] sm:$0xf]  ;;  %v3356_v39 = vld [vmem:[#allocation8 + $0xd0] sm:$0xf]  ;;  %v3800_v8 = vld [vmem:[#allocation8 + $0xd4] sm:$0xf0] }
  0xc5   :  { %1661 = vmatpush.bf16.msrb.mxu1 %v2813_v0  ;;  %v2858_v0 = vld [vmem:[#allocation5 + $0x318] sm:$0xf0]  ;;  %v3782_v47 = vld [vmem:[#allocation8 + $0x44] sm:$0xf0]  ;;  %v3357_v48 = vor.u32 %v3800_v8, %v3356_v39 }
  0xc6   :  { %1688 = vmatpush.bf16.msra.mxu2 %v3085_v63  ;;  %1675 = vmatpush.bf16.msrb.mxu3 %v2941_v4  ;;  %v3674_v63 = vld [vmem:[#allocation5 + $0x30c] sm:$0xf]  ;;  %v3146_v4 = vld [vmem:[#allocation5 + $0x558] sm:$0xf0]  ;;  %v3285_v56 = vor.u32 %v3782_v47, %v3284_v46 }
  0xc7   :  { %v2861_v15 = vor.u32 %v3674_v63, %v2858_v0  ;;  %v3149_v16 = vor.u32 %v3746_v3, %v3146_v4  ;;  %v3796_v63 = vld [vmem:[#allocation8 + $0xb4] sm:$0xf0]  ;;  %v3778_v7 = vld [vmem:[#allocation8 + $0x24] sm:$0xf0] }
  0xc8   :  { %1702 = vmatpush.bf16.msrb.mxu0 %v3213_v18  ;;  %v3242_v18 = vld [vmem:[#allocation5 + $0x618] sm:$0xf0] }
  0xc9   :  { %1662 = vmatpush.bf16.msrb.mxu1 %v2797_v14  ;;  %v310_v14 = vperm.slane %v4137_v51, 0 }
  0xca   :  { %1689 = vmatpush.bf16.msra.mxu2 %v3069_v13  ;;  %1676 = vmatpush.bf16.msrb.mxu3 %v2925_v17  ;;  %v2986_v13 = vld [vmem:[#allocation5 + $0x418] sm:$0xf0]  ;;  %v3770_v17 = vld [vmem:[#allocation5 + $0x60c] sm:$0xf] }
  0xcb   :  { %v2989_v22 = vor.u32 %v3706_v12, %v2986_v13  ;;  %v1349_v45 = vadd.f32 %v1348_v33, %v310_v14  ;;  %v3803_v33 = vld [vmem:[#allocation8 + $0xf4] sm:$0xf] }
  0xcc   :  { %1703 = vmatpush.bf16.msrb.mxu0 %v3197_v29  ;;  %v3133_v29 = vor.u32 %v3742_v55, %v3130_v20  ;;  %v1376_v43 = vpop.f32.mrf.mxu2  ;;  %v3324_v55 = vld [vmem:[#allocation8 + $0x90] sm:$0xf]  ;;  %v3792_v20 = vld [vmem:[#allocation8 + $0x94] sm:$0xf0] }
  0xcd   :  { %1663 = vmatpush.bf16.msrb.mxu1 %v2781_v25  ;;  %v3245_v25 = vor.u32 %v3770_v17, %v3242_v18 }
  0xce   :  { %1690 = vmatpush.bf16.msra.mxu2 %v3053_v24  ;;  %1677 = vmatpush.bf16.msrb.mxu3 %v2909_v28  ;;  %v3786_v24 = vld [vmem:[#allocation8 + $0x64] sm:$0xf0]  ;;  %v1347_v28 = vadd.f32 %v1346_v58, %v310_v14  ;;  %v3276_v58 = vld [vmem:[#allocation8 + $0x30] sm:$0xf] }
  0xcf   :  { %v3301_v30 = vor.u32 %v3786_v24, %v3300_v23 }
  0xd0   :  { %1704 = vmatpush.bf16.msrb.mxu0 %v3181_v41  ;;  %v1388_v41 = vpop.f32.mrf.mxu3 }
  0xd1   :  { %1664 = vmatpush.bf16.msrb.mxu1 %v2765_v38  ;;  %v1362_v38 = vpop.f32.mrf.mxu1 }
  0xd2   :  { %1691 = vmatpush.bf16.msra.mxu2 %v3037_v36  ;;  %1678 = vmatpush.bf16.msrb.mxu3 %v2893_v40  ;;  %v3365_v36 = vor.u32 %v3802_v27, %v3364_v26  ;;  %v1361_v40 = vadd.f32 %v1360_v1, %v1347_v28  ;;  %v1363_v53 = vadd.f32 %v1362_v38, %v1349_v45  ;;  %v3774_v26 = vld [vmem:[#allocation8 + $0x4] sm:$0xf0]  ;;  %v3787_v27 = vld [vmem:[#allocation8 + $0x74] sm:$0xf]  ;;  %v3801_v45 = vld [vmem:[#allocation8 + $0xe4] sm:$0xf] }
  0xd3   :  { %v3325_v28 = vor.u32 %v3792_v20, %v3324_v55  ;;  %v3334_v55 = vld [vmem:[#allocation8 + $0xa8] sm:$0xf0]  ;;  %v3428_v20 = vld [vmem:[#allocation8 + $0x160] sm:$0xf] }
  0xd4   :  { %1705 = vmatpush.bf16.msrb.mxu0 %v3165_v61  ;;  %v1430_v1 = vpop.f32.mrf.mxu2  ;;  %v1377_v2 = vadd.f32 %v1376_v43, %v1363_v53  ;;  %v3358_v53 = vld [vmem:[#allocation8 + $0xd8] sm:$0xf0] }
  0xd5   :  { %1665 = vmatpush.bf16.msrb.mxu1 %v2749_v52  ;;  %v3798_v52 = vld [vmem:[#allocation8 + $0xc4] sm:$0xf0] }
  0xd6   :  { %1692 = vmatpush.bf16.msra.mxu2 %v3021_v49  ;;  %1679 = vmatpush.bf16.msrb.mxu3 %v2877_v59  ;;  %v3348_v49 = vld [vmem:[#allocation8 + $0xc0] sm:$0xf]  ;;  %v3780_v59 = vld [vmem:[#allocation8 + $0x34] sm:$0xf0] }
  0xd7   :  { %v3349_v61 = vor.u32 %v3798_v52, %v3348_v49  ;;  %v3277_v3 = vor.u32 %v3780_v59, %v3276_v58  ;;  %v3294_v49 = vld [vmem:[#allocation8 + $0x58] sm:$0xf0]  ;;  %v3781_v58 = vld [vmem:[#allocation8 + $0x44] sm:$0xf]  ;;  %v3286_v59 = vld [vmem:[#allocation8 + $0x48] sm:$0xf0] }
  0xd8   :  { %1706 = vmatpush.bf16.msrb.mxu0 %v3149_v16  ;;  %v1402_v57 = vpop.f32.mrf.mxu0  ;;  %v1390_v4 = vpop.f32.mrf.mxu3  ;;  %v3776_v16 = vld [vmem:[#allocation8 + $0x14] sm:$0xf0] }
  0xd9   :  { %1666 = vmatpush.bf16.msrb.mxu1 %v2733_v11  ;;  %v1416_v62 = vpop.f32.mrf.mxu1  ;;  %v3794_v11 = vld [vmem:[#allocation8 + $0xa4] sm:$0xf0]  ;;  %v1391_v12 = vadd.f32 %v1390_v4, %v1377_v2  ;;  %v3779_v2 = vld [vmem:[#allocation8 + $0x34] sm:$0xf] }
  0xda   :  { %1693 = vmatpush.bf16.msra.mxu2 %v3005_v6  ;;  %1680 = vmatpush.bf16.msrb.mxu3 %v2861_v15  ;;  %v3268_v6 = vld [vmem:[#allocation8 + $0x20] sm:$0xf]  ;;  %v3260_v15 = vld [vmem:[#allocation8 + $0x10] sm:$0xf]  ;;  %v3333_v17 = vor.u32 %v3794_v11, %v3332_v10  ;;  %v3342_v10 = vld [vmem:[#allocation8 + $0xb8] sm:$0xf0] }
  0xdb   :  { %v3269_v13 = vor.u32 %v3778_v7, %v3268_v6  ;;  %v3820_v11 = vld [vmem:[#allocation8 + $0x174] sm:$0xf0] }
  0xdc   :  { %1667 = vmatmul.bf16.vlgmr.msrb.gmra.mxu1 %v4097_v54  ;;  %1707 = vmatpush.bf16.msrb.mxu0 %v3133_v29  ;;  %v3293_v54 = vor.u32 %v3784_v35, %v3292_v34  ;;  %v1432_v24 = vpop.f32.mrf.mxu2  ;;  %v3374_v34 = vld [vmem:[#allocation8 + $0xf8] sm:$0xf0] }
  0xdd   :  { %2145 = vmatpush.bf16.msra.mxu1 %v3373_v21  ;;  %1681 = vmatmul.bf16.vlgmr.msrb.gmra.mxu3 %v4101_v60  ;;  %v1375_v60 = vadd.f32 %v4139_v5, %v1361_v40  ;;  %v3785_v40 = vld [vmem:[#allocation8 + $0x64] sm:$0xf]  ;;  %v3377_v43 = vor.u32 %v3803_v33, %v3374_v34  ;;  %v3420_v33 = vld [vmem:[#allocation8 + $0x150] sm:$0xf] }
  0xde   :  { %2131 = vmatpush.bf16.msra.mxu3 %v3309_v19  ;;  %1694 = vmatpush.bf16.msra.mxu2 %v2989_v22  ;;  %v3261_v22 = vor.u32 %v3776_v16, %v3260_v15  ;;  %v3777_v16 = vld [vmem:[#allocation8 + $0x24] sm:$0xf] }
  0xdf   :  { %v1389_v0 = vadd.f32 %v1388_v41, %v1375_v60  ;;  %v3302_v41 = vld [vmem:[#allocation8 + $0x68] sm:$0xf0]  ;;  %v3799_v60 = vld [vmem:[#allocation8 + $0xd4] sm:$0xf] }
  0xe0   :  { %1708 = vmatpush.bf16.msrb.mxu0 %v3117_v44  ;;  %v1444_v8 = vpop.f32.mrf.mxu3  ;;  %v3305_v47 = vor.u32 %v3785_v40, %v3302_v41 }
  0xe1   :  { %1695 = vmatmul.bf16.vlgmr.msra.gmra.mxu2 %v4113_v37  ;;  %2146 = vmatpush.bf16.msra.mxu1 %v3365_v36  ;;  %v3340_v37 = vld [vmem:[#allocation8 + $0xb0] sm:$0xf]  ;;  %v1403_v5 = vadd.f32 %v1402_v57, %v1389_v0  ;;  %v1418_v19 = vpop.f32.mrf.mxu1  ;;  %v311_v57 = vperm.slane %v4137_v51, 1  ;;  %v3289_v0 = vor.u32 %v3781_v58, %v3286_v59  ;;  %v3812_v59 = vld [vmem:[#allocation8 + $0x134] sm:$0xf0] }
  0xe2   :  { %1722 = vmatpush.bf16.msrb.mxu2 %v3245_v25  ;;  %2132 = vmatpush.bf16.msra.mxu3 %v3301_v30  ;;  %v3341_v9 = vor.u32 %v3796_v63, %v3340_v37  ;;  %v3252_v25 = vld [vmem:[#allocation8] sm:$0xf]  ;;  %v3310_v30 = vld [vmem:[#allocation8 + $0x78] sm:$0xf0]  ;;  %v3350_v37 = vld [vmem:[#allocation8 + $0xc8] sm:$0xf0] }
  0xe3   :  { %1709 = vmatmul.bf16.vlgmr.msrb.gmra.mxu0 %v4115_v42  ;;  %v1417_v14 = vadd.f32 %v1416_v62, %v1403_v5  ;;  %v1404_v42 = vpop.f32.mrf.mxu0  ;;  %v3253_v36 = vor.u32 %v3774_v26, %v3252_v25  ;;  %v3313_v39 = vor.u32 %v3787_v27, %v3310_v30  ;;  %v3797_v62 = vld [vmem:[#allocation8 + $0xc4] sm:$0xf]  ;;  %v3436_v5 = vld [vmem:[#allocation8 + $0x170] sm:$0xf]  ;;  %v3775_v26 = vld [vmem:[#allocation8 + $0x14] sm:$0xf] }
  0xe4   :  { %v1405_v18 = vadd.f32 %v1404_v42, %v1391_v12  ;;  %v1458_v46 = vpop.f32.mrf.mxu2  ;;  %v3353_v4 = vor.u32 %v3797_v62, %v3350_v37  ;;  %v3437_v12 = vor.u32 %v3820_v11, %v3436_v5  ;;  %v3262_v27 = vld [vmem:[#allocation8 + $0x18] sm:$0xf0]  ;;  %v3404_v58 = vld [vmem:[#allocation8 + $0x130] sm:$0xf]  ;;  %v3808_v11 = vld [vmem:[#allocation8 + $0x114] sm:$0xf0] }
  0xe5   :  { %2147 = vmatpush.bf16.msra.mxu1 %v3357_v48  ;;  %v1431_v23 = vadd.f32 %v1430_v1, %v1417_v14  ;;  %v3783_v48 = vld [vmem:[#allocation8 + $0x54] sm:$0xf]  ;;  %v1445_v1 = vadd.f32 %v1444_v8, %v311_v57  ;;  %v3254_v8 = vld [vmem:[#allocation8 + $0x8] sm:$0xf0] }
  0xe6   :  { %2133 = vmatpush.bf16.msra.mxu3 %v3293_v54  ;;  %v1419_v21 = vadd.f32 %v1418_v19, %v1405_v18  ;;  %v3366_v54 = vld [vmem:[#allocation8 + $0xe8] sm:$0xf0]  ;;  %2159 = vmatpush.bf16.msra.mxu2 %v3437_v12  ;;  %v3793_v19 = vld [vmem:[#allocation8 + $0xa4] sm:$0xf] }
  0xe7   :  { %v1729_v38 = vmax.f32 %v1431_v23, 0.0  ;;  %v3369_v52 = vor.u32 %v3801_v45, %v3366_v54  ;;  %v1459_v14 = vadd.f32 %v1458_v46, %v1445_v1  ;;  %v3789_v45 = vld [vmem:[#allocation8 + $0x84] sm:$0xf]  ;;  %v3318_v54 = vld [vmem:[#allocation8 + $0x88] sm:$0xf0] }
  0xe8   :  { %v1433_v29 = vadd.f32 %v1432_v24, %v1419_v21  ;;  %v1446_v63 = vpop.f32.mrf.mxu3 }
  0xe9   :  { %2148 = vmatpush.bf16.msra.mxu1 %v3349_v61  ;;  %v3361_v61 = vor.u32 %v3799_v60, %v3358_v53  ;;  %v1447_v42 = vadd.f32 %v1446_v63, %v311_v57  ;;  %v3814_v60 = vld [vmem:[#allocation8 + $0x144] sm:$0xf0]  ;;  %v3396_v63 = vld [vmem:[#allocation8 + $0x120] sm:$0xf] }
  0xea   :  { %2134 = vmatpush.bf16.msra.mxu3 %v3285_v56  ;;  %v1733_v35 = vmax.f32 %v1433_v29, 0.0  ;;  %v3297_v56 = vor.u32 %v3783_v48, %v3294_v49  ;;  %v3321_v49 = vor.u32 %v3789_v45, %v3318_v54  ;;  %v3807_v54 = vld [vmem:[#allocation8 + $0x114] sm:$0xf] }
  0xec   :  { %v4149_v44 = vpack.c.bf16 %v1733_v35, %v1729_v38  ;;  %v1460_v7 = vpop.f32.mrf.mxu2  ;;  %v3265_v35 = vor.u32 %v3775_v26, %v3262_v27 }
  0xed   :  { %2149 = vmatpush.bf16.msra.mxu1 %v3341_v9  ;;  %v3795_v9 = vld [vmem:[#allocation8 + $0xb4] sm:$0xf]  ;;  %v1461_v24 = vadd.f32 %v1460_v7, %v1447_v42  ;;  %v3806_v42 = vld [vmem:[#allocation8 + $0x104] sm:$0xf0] }
  0xee   :  { %2135 = vmatpush.bf16.msra.mxu3 %v3277_v3  ;;  %v3278_v3 = vld [vmem:[#allocation8 + $0x38] sm:$0xf0]  ;;  %v3345_v18 = vor.u32 %v3795_v9, %v3342_v10  ;;  %v3388_v10 = vld [vmem:[#allocation8 + $0x110] sm:$0xf] }
  0xef   :  { %v3389_v12 = vor.u32 %v3808_v11, %v3388_v10 }
  0xf1   :  { %3249 = vmatmul.msk.bf16.vlgmr.msrb.gmra.mxu2 %vm1333_vm0, %v4109_v50  ;;  %2150 = vmatpush.bf16.msra.mxu1 %v3333_v17  ;;  %v3317_v50 = vor.u32 %v3790_v32, %v3316_v31  ;;  %v3270_v17 = vld [vmem:[#allocation8 + $0x28] sm:$0xf0]  ;;  %v3791_v31 = vld [vmem:[#allocation8 + $0x94] sm:$0xf]  ;;  %v3326_v32 = vld [vmem:[#allocation8 + $0x98] sm:$0xf0] }
  0xf2   :  { %2136 = vmatpush.bf16.msra.mxu3 %v3269_v13  ;;  %v3281_v13 = vor.u32 %v3779_v2, %v3278_v3  ;;  %v3273_v21 = vor.u32 %v3777_v16, %v3270_v17  ;;  %v3329_v40 = vor.u32 %v3791_v31, %v3326_v32  ;;  %v3819_v16 = vld [vmem:[#allocation8 + $0x174] sm:$0xf]  ;;  %v3500_v32 = vld [vmem:[#allocation8 + $0x1f0] sm:$0xf] }
  0xf5   :  { %2151 = vmatpush.bf16.msra.mxu1 %v3325_v28  ;;  %v3337_v28 = vor.u32 %v3793_v19, %v3334_v55  ;;  %v3430_v19 = vld [vmem:[#allocation8 + $0x168] sm:$0xf0] }
  0xf6   :  { %2137 = vmatpush.bf16.msra.mxu3 %v3261_v22  ;;  %v3818_v22 = vld [vmem:[#allocation8 + $0x164] sm:$0xf0] }
  0xf7   :  { %v3429_v29 = vor.u32 %v3818_v22, %v3428_v20  ;;  %v3815_v20 = vld [vmem:[#allocation8 + $0x154] sm:$0xf] }
  0xf8   :  { %v1472_v6 = vpop.f32.mrf.mxu0 }
  0xf9   :  { %2152 = vmatpush.bf16.msra.mxu1 %v3317_v50  ;;  %v1486_v15 = vpop.f32.mrf.mxu1  ;;  %v1473_v23 = vadd.f32 %v1472_v6, %v1459_v14  ;;  %2160 = vmatpush.bf16.msra.mxu2 %v3429_v29  ;;  %v3773_v50 = vld [vmem:[#allocation8 + $0x4] sm:$0xf]  ;;  %v3380_v14 = vld [vmem:[#allocation8 + $0x100] sm:$0xf]  ;;  %v3811_v29 = vld [vmem:[#allocation8 + $0x134] sm:$0xf] }
  0xfa   :  { %2138 = vmatpush.bf16.msra.mxu3 %v3253_v36  ;;  %v3816_v36 = vld [vmem:[#allocation8 + $0x154] sm:$0xf0]  ;;  %v3257_v46 = vor.u32 %v3773_v50, %v3254_v8  ;;  %v3492_v8 = vld [vmem:[#allocation8 + $0x1e0] sm:$0xf] }
  0xfb   :  { %v1487_v38 = vadd.f32 %v1486_v15, %v1473_v23  ;;  %v3421_v41 = vor.u32 %v3816_v36, %v3420_v33  ;;  %v3381_v15 = vor.u32 %v3806_v42, %v3380_v14  ;;  %v3836_v33 = vld [vmem:[#allocation8 + $0x1f4] sm:$0xf0]  ;;  %v3809_v36 = vld [vmem:[#allocation8 + $0x124] sm:$0xf]  ;;  %v3460_v14 = vld [vmem:[#allocation8 + $0x1a0] sm:$0xf] }
  0xfc   :  { %v3826_v42 = vld [vmem:[#allocation8 + $0x1a4] sm:$0xf0] }
  0xfd   :  { %2201 = vmatpush.bf16.msrb.mxu1 %v3377_v43  ;;  %2139 = vmatmul.bf16.vlgmr.msra.gmra.mxu3 %v4149_v44 }
  0xfe   :  { %2187 = vmatpush.bf16.msrb.mxu3 %v3313_v39  ;;  %2161 = vmatpush.bf16.msra.mxu2 %v3421_v41 }
 0x100   :  { %v1500_v25 = vpop.f32.mrf.mxu3  ;;  %v1474_v30 = vpop.f32.mrf.mxu0 }
 0x101   :  { %2202 = vmatpush.bf16.msrb.mxu1 %v3369_v52  ;;  %v1475_v39 = vadd.f32 %v1474_v30, %v1461_v24  ;;  %v1488_v43 = vpop.f32.mrf.mxu1  ;;  %v3412_v52 = vld [vmem:[#allocation8 + $0x140] sm:$0xf]  ;;  %v3813_v24 = vld [vmem:[#allocation8 + $0x144] sm:$0xf]  ;;  %v3406_v30 = vld [vmem:[#allocation8 + $0x138] sm:$0xf0] }
 0x102   :  { %2188 = vmatpush.bf16.msrb.mxu3 %v3305_v47  ;;  %v1501_v47 = vadd.f32 %v1500_v25, %v1487_v38  ;;  %v3413_v57 = vor.u32 %v3814_v60, %v3412_v52  ;;  %v3414_v25 = vld [vmem:[#allocation8 + $0x148] sm:$0xf0]  ;;  %v3409_v31 = vor.u32 %v3811_v29, %v3406_v30  ;;  %v3832_v60 = vld [vmem:[#allocation8 + $0x1d4] sm:$0xf0] }
 0x103   :  { %v1489_v48 = vadd.f32 %v1488_v43, %v1475_v39  ;;  %v3417_v27 = vor.u32 %v3813_v24, %v3414_v25  ;;  %v3398_v38 = vld [vmem:[#allocation8 + $0x128] sm:$0xf0]  ;;  %v3444_v24 = vld [vmem:[#allocation8 + $0x180] sm:$0xf]  ;;  %v3822_v25 = vld [vmem:[#allocation8 + $0x184] sm:$0xf0] }
 0x104   :  { %v1514_v34 = vpop.f32.mrf.mxu2  ;;  %2162 = vmatpush.bf16.msra.mxu2 %v3413_v57  ;;  %v3401_v50 = vor.u32 %v3809_v36, %v3398_v38  ;;  %v3494_v36 = vld [vmem:[#allocation8 + $0x1e8] sm:$0xf0] }
 0x105   :  { %2203 = vmatpush.bf16.msrb.mxu1 %v3361_v61  ;;  %v3405_v61 = vor.u32 %v3812_v59, %v3404_v58  ;;  %v1515_v62 = vadd.f32 %v1514_v34, %v1501_v47  ;;  %v312_v34 = vperm.slane %v4137_v51, 2  ;;  %v3484_v47 = vld [vmem:[#allocation8 + $0x1d0] sm:$0xf]  ;;  %v3805_v59 = vld [vmem:[#allocation8 + $0x104] sm:$0xf] }
 0x106   :  { %2189 = vmatpush.bf16.msrb.mxu3 %v3297_v56  ;;  %v3485_v57 = vor.u32 %v3832_v60, %v3484_v47  ;;  %v3470_v47 = vld [vmem:[#allocation8 + $0x1b8] sm:$0xf0]  ;;  %v313_v60 = vperm.slane %v4137_v51, 3 }
 0x108   :  { %v1502_v53 = vpop.f32.mrf.mxu3  ;;  %v1528_v56 = vpop.f32.mrf.mxu0  ;;  %2163 = vmatpush.bf16.msra.mxu2 %v3405_v61  ;;  %v3382_v61 = vld [vmem:[#allocation8 + $0x108] sm:$0xf0] }
 0x109   :  { %2204 = vmatpush.bf16.msrb.mxu1 %v3353_v4  ;;  %v1503_v37 = vadd.f32 %v1502_v53, %v1489_v48  ;;  %v1529_v3 = vadd.f32 %v1528_v56, %v1515_v62  ;;  %v3385_v62 = vor.u32 %v3805_v59, %v3382_v61  ;;  %v3823_v61 = vld [vmem:[#allocation8 + $0x194] sm:$0xf] }
 0x10a   :  { %2190 = vmatpush.bf16.msrb.mxu3 %v3289_v0  ;;  %v3810_v0 = vld [vmem:[#allocation8 + $0x124] sm:$0xf0] }
 0x10b   :  { %v3397_v2 = vor.u32 %v3810_v0, %v3396_v63  ;;  %v1730_v7 = vmax.f32 %v1529_v3, 0.0  ;;  %v3830_v63 = vld [vmem:[#allocation8 + $0x1c4] sm:$0xf0] }
 0x10c   :  { %v1516_v1 = vpop.f32.mrf.mxu2 }
 0x10d   :  { %2205 = vmatpush.bf16.msrb.mxu1 %v3345_v18  ;;  %v1517_v4 = vadd.f32 %v1516_v1, %v1503_v37  ;;  %2164 = vmatpush.bf16.msra.mxu2 %v3397_v2  ;;  %v3817_v18 = vld [vmem:[#allocation8 + $0x164] sm:$0xf]  ;;  %v3476_v37 = vld [vmem:[#allocation8 + $0x1c0] sm:$0xf] }
 0x10e   :  { %2191 = vmatpush.bf16.msrb.mxu3 %v3281_v13  ;;  %v3433_v55 = vor.u32 %v3817_v18, %v3430_v19  ;;  %v3477_v2 = vor.u32 %v3830_v63, %v3476_v37  ;;  %v3452_v19 = vld [vmem:[#allocation8 + $0x190] sm:$0xf] }
 0x110   :  { %v1530_v5 = vpop.f32.mrf.mxu0 }
 0x111   :  { %2206 = vmatpush.bf16.msrb.mxu1 %v3337_v28  ;;  %v1531_v6 = vadd.f32 %v1530_v5, %v1517_v4  ;;  %2165 = vmatpush.bf16.msra.mxu2 %v3389_v12  ;;  %v3468_v5 = vld [vmem:[#allocation8 + $0x1b0] sm:$0xf] }
 0x112   :  { %2192 = vmatpush.bf16.msrb.mxu3 %v3273_v21  ;;  %v3422_v21 = vld [vmem:[#allocation8 + $0x158] sm:$0xf0] }
 0x113   :  { %v1734_v9 = vmax.f32 %v1531_v6, 0.0  ;;  %v3425_v23 = vor.u32 %v3815_v20, %v3422_v21  ;;  %v3828_v6 = vld [vmem:[#allocation8 + $0x1b4] sm:$0xf0] }
 0x114   :  { %v3469_v10 = vor.u32 %v3828_v6, %v3468_v5 }
 0x115   :  { %2207 = vmatpush.bf16.msrb.mxu1 %v3329_v40  ;;  %v1738_v13 = vpack.c.bf16 %v1734_v9, %v1730_v7  ;;  %2166 = vmatpush.bf16.msra.mxu2 %v3381_v15  ;;  %v3834_v40 = vld [vmem:[#allocation8 + $0x1e4] sm:$0xf0] }
 0x116   :  { %2193 = vmatpush.bf16.msrb.mxu3 %v3265_v35  ;;  %v3501_v35 = vor.u32 %v3836_v33, %v3500_v32  ;;  %v3493_v43 = vor.u32 %v3834_v40, %v3492_v8  ;;  %v3502_v32 = vld [vmem:[#allocation8 + $0x1f8] sm:$0xf0] }
 0x117   :  { %2153 = vmatmul.bf16.vlgmr.msra.gmra.mxu1 %v1738_v13 }
 0x118   :  { %2173 = vmatpush.bf16.msra.mxu0 %v3501_v35  ;;  %v3833_v35 = vld [vmem:[#allocation8 + $0x1e4] sm:$0xf] }
 0x119   :  { %2208 = vmatpush.bf16.msrb.mxu1 %v3321_v49  ;;  %v1542_v22 = vpop.f32.mrf.mxu1  ;;  %v3497_v38 = vor.u32 %v3833_v35, %v3494_v36  ;;  %v3848_v35 = vld [vmem:[#allocation10 + $0x58] sm:$0xff]  ;;  %v3847_v36 = vld [vmem:[#allocation10 + $0x50] sm:$0xff] }
 0x11a   :  { %2194 = vmatpush.bf16.msrb.mxu3 %v3257_v46  ;;  %v1543_v41 = vadd.f32 %v1542_v22, %v312_v34  ;;  %v3390_v46 = vld [vmem:[#allocation8 + $0x118] sm:$0xf0] }
 0x11b   :  { %v3393_v52 = vor.u32 %v3807_v54, %v3390_v46  ;;  %v3827_v46 = vld [vmem:[#allocation8 + $0x1b4] sm:$0xf] }
 0x11c   :  { %v1570_v26 = vpop.f32.mrf.mxu0  ;;  %2174 = vmatpush.bf16.msra.mxu0 %v3493_v43  ;;  %v3829_v43 = vld [vmem:[#allocation8 + $0x1c4] sm:$0xf] }
 0x11d   :  { %2195 = vmatmul.bf16.vlgmr.msrb.gmra.mxu3 %v4149_v44  ;;  %v3438_v44 = vld [vmem:[#allocation8 + $0x178] sm:$0xf0] }
 0x11e   :  { %v3441_v17 = vor.u32 %v3819_v16, %v3438_v44  ;;  %v3461_v44 = vor.u32 %v3826_v42, %v3460_v14 }
 0x120   :  { %2215 = vmatpush.bf16.msrb.mxu2 %v3441_v17  ;;  %v1556_v28 = vpop.f32.mrf.mxu3  ;;  %2175 = vmatpush.bf16.msra.mxu0 %v3485_v57  ;;  %v3825_v57 = vld [vmem:[#allocation8 + $0x1a4] sm:$0xf] }
 0x121   :  { %v1544_v39 = vpop.f32.mrf.mxu1  ;;  %v1557_v53 = vadd.f32 %v1556_v28, %v1543_v41 }
 0x122   :  { %v1545_v56 = vadd.f32 %v1544_v39, %v312_v34  ;;  %v3831_v39 = vld [vmem:[#allocation8 + $0x1d4] sm:$0xf] }
 0x123   :  { %v1571_v0 = vadd.f32 %v1570_v26, %v1557_v53 }
 0x124   :  { %2216 = vmatpush.bf16.msrb.mxu2 %v3433_v55  ;;  %v1572_v45 = vpop.f32.mrf.mxu0  ;;  %v1584_v48 = vpop.f32.mrf.mxu2  ;;  %2176 = vmatpush.bf16.msra.mxu0 %v3477_v2  ;;  %v3824_v55 = vld [vmem:[#allocation8 + $0x194] sm:$0xf0] }
 0x125   :  { %v1585_v7 = vadd.f32 %v1584_v48, %v1571_v0  ;;  %v3453_v22 = vor.u32 %v3824_v55, %v3452_v19  ;;  %v3473_v48 = vor.u32 %v3827_v46, %v3470_v47  ;;  %v3821_v0 = vld [vmem:[#allocation8 + $0x184] sm:$0xf] }
 0x127   :  { %2209 = vmatmul.bf16.vlgmr.msrb.gmra.mxu1 %v1738_v13 }
 0x128   :  { %2217 = vmatpush.bf16.msrb.mxu2 %v3425_v23  ;;  %v1558_v49 = vpop.f32.mrf.mxu3  ;;  %2177 = vmatpush.bf16.msra.mxu0 %v3469_v10 }
 0x129   :  { %v1559_v1 = vadd.f32 %v1558_v49, %v1545_v56 }
 0x12b   :  { %v1573_v9 = vadd.f32 %v1572_v45, %v1559_v1  ;;  %v3478_v45 = vld [vmem:[#allocation8 + $0x1c8] sm:$0xf0] }
 0x12c   :  { %2218 = vmatpush.bf16.msrb.mxu2 %v3417_v27  ;;  %v1626_v3 = vpop.f32.mrf.mxu0  ;;  %v1586_v11 = vpop.f32.mrf.mxu2  ;;  %2178 = vmatpush.bf16.msra.mxu0 %v3461_v44  ;;  %v3445_v27 = vor.u32 %v3822_v25, %v3444_v24  ;;  %v3481_v54 = vor.u32 %v3829_v43, %v3478_v45  ;;  %v3446_v1 = vld [vmem:[#allocation8 + $0x188] sm:$0xf0]  ;;  %v3843_v24 = vld [vmem:[#allocation10 + $0x30] sm:$0xff] }
 0x12d   :  { %v1587_v15 = vadd.f32 %v1586_v11, %v1573_v9  ;;  %v3449_v5 = vor.u32 %v3821_v0, %v3446_v1  ;;  %v3842_v25 = vld [vmem:[#allocation10 + $0x28] sm:$0xff] }
 0x130   :  { %2219 = vmatpush.bf16.msrb.mxu2 %v3409_v31  ;;  %2179 = vmatpush.bf16.msra.mxu0 %v3453_v22  ;;  %v3835_v31 = vld [vmem:[#allocation8 + $0x1f4] sm:$0xf] }
 0x131   :  { %v3505_v33 = vor.u32 %v3835_v31, %v3502_v32  ;;  %v3838_v31 = vld [vmem:[#allocation10 + $0x8] sm:$0xff] }
 0x132   :  { %v3850_v32 = vld [vmem:[#allocation10 + $0x68] sm:$0xff] }
 0x134   :  { %2220 = vmatpush.bf16.msrb.mxu2 %v3401_v50  ;;  %v1628_v23 = vpop.f32.mrf.mxu0  ;;  %2180 = vmatpush.bf16.msra.mxu0 %v3445_v27  ;;  %v3486_v50 = vld [vmem:[#allocation8 + $0x1d8] sm:$0xf0] }
 0x135   :  { %v3489_v8 = vor.u32 %v3831_v39, %v3486_v50  ;;  %v3840_v27 = vld [vmem:[#allocation10 + $0x18] sm:$0xff] }
 0x138   :  { %2221 = vmatpush.bf16.msrb.mxu2 %v3393_v52  ;;  %2229 = vmatpush.bf16.msrb.mxu0 %v3505_v33  ;;  %v3837_v33 = vld [vmem:[#allocation10] sm:$0xff] }
 0x139   :  { %v1598_v58 = vpop.f32.mrf.mxu1 }
 0x13a   :  { %v1599_v12 = vadd.f32 %v1598_v58, %v1585_v7  ;;  %v3462_v58 = vld [vmem:[#allocation8 + $0x1a8] sm:$0xf0] }
 0x13b   :  { %v3465_v59 = vor.u32 %v3825_v57, %v3462_v58 }
 0x13c   :  { %2222 = vmatpush.bf16.msrb.mxu2 %v3385_v62  ;;  %2230 = vmatpush.bf16.msrb.mxu0 %v3497_v38  ;;  %v3454_v62 = vld [vmem:[#allocation8 + $0x198] sm:$0xf0] }
 0x13d   :  { %v3457_v63 = vor.u32 %v3823_v61, %v3454_v62 }
 0x140   :  { %v1612_v4 = vpop.f32.mrf.mxu3  ;;  %v1654_v40 = vpop.f32.mrf.mxu0  ;;  %2231 = vmatpush.bf16.msrb.mxu0 %v3489_v8  ;;  %v3846_v8 = vld [vmem:[#allocation10 + $0x48] sm:$0xff] }
 0x141   :  { %v1600_v13 = vpop.f32.mrf.mxu1  ;;  %v1613_v16 = vadd.f32 %v1612_v4, %v1599_v12 }
 0x142   :  { %v1601_v17 = vadd.f32 %v1600_v13, %v1587_v15 }
 0x143   :  { %v1627_v20 = vadd.f32 %v1626_v3, %v1613_v16 }
 0x144   :  { %v1640_v30 = vpop.f32.mrf.mxu2  ;;  %2232 = vmatpush.bf16.msrb.mxu0 %v3481_v54 }
 0x145   :  { %v1731_v28 = vmax.f32 %v1627_v20, 0.0  ;;  %v1641_v37 = vadd.f32 %v1640_v30, %v313_v60  ;;  %v3851_v30 = vld [vmem:[#allocation10 + $0x70] sm:$0xff] }
 0x147   :  { %v1655_v4 = vadd.f32 %v1654_v40, %v1641_v37  ;;  %v1805_v40 = vld [vmem:[%s4172_s4] sm:$0x3] }
 0x148   :  { %v1614_v18 = vpop.f32.mrf.mxu3  ;;  %2233 = vmatpush.bf16.msrb.mxu0 %v3473_v48  ;;  %v1656_v53 = vpop.f32.mrf.mxu0  ;;  %v1807_v43 = vperm.slane %v1805_v40, 0  ;;  %v1808_v1 = vperm.slane %v1805_v40, 1 }
 0x149   :  { %v1615_v21 = vadd.f32 %v1614_v18, %v1601_v17 }
 0x14b   :  { %v1629_v26 = vadd.f32 %v1628_v23, %v1615_v21  ;;  %v3844_v23 = vld [vmem:[#allocation10 + $0x38] sm:$0xff] }
 0x14c   :  { %v1642_v41 = vpop.f32.mrf.mxu2  ;;  %2234 = vmatpush.bf16.msrb.mxu0 %v3465_v59  ;;  %2381 = vmatpush.bf16.msra.mxu3 %v3844_v23 }
 0x14d   :  { %v1735_v29 = vmax.f32 %v1629_v26, 0.0  ;;  %v1643_v2 = vadd.f32 %v1642_v41, %v313_v60  ;;  %v3841_v26 = vld [vmem:[#allocation10 + $0x20] sm:$0xff] }
 0x14e   :  { %v3845_v41 = vld [vmem:[#allocation10 + $0x40] sm:$0xff] }
 0x14f   :  { %v1739_v34 = vpack.c.bf16 %v1735_v29, %v1731_v28  ;;  %v1657_v7 = vadd.f32 %v1656_v53, %v1643_v2  ;;  %v3852_v28 = vld [vmem:[#allocation10 + $0x78] sm:$0xff]  ;;  %v3839_v29 = vld [vmem:[#allocation10 + $0x10] sm:$0xff] }
 0x150   :  { %2235 = vmatpush.bf16.msrb.mxu0 %v3457_v63  ;;  %2382 = vmatpush.bf16.msra.mxu3 %v3843_v24 }
 0x151   :  { %2167 = vmatmul.bf16.vlgmr.msra.gmra.mxu2 %v1739_v34  ;;  %2395 = vmatpush.bf16.msra.mxu1 %v3852_v28 }
 0x154   :  { %2236 = vmatpush.bf16.msrb.mxu0 %v3449_v5  ;;  %2383 = vmatpush.bf16.msra.mxu3 %v3842_v25 }
 0x155   :  { %2396 = vmatpush.bf16.msra.mxu1 %v3851_v30 }
 0x158   :  { %2384 = vmatpush.bf16.msra.mxu3 %v3841_v26 }
 0x159   :  { %v1668_v49 = vpop.f32.mrf.mxu1  ;;  %2397 = vmatpush.bf16.msra.mxu1 %v3850_v32 }
 0x15a   :  { %v1669_v9 = vadd.f32 %v1668_v49, %v1655_v4 }
 0x15c   :  { %2385 = vmatpush.bf16.msra.mxu3 %v3840_v27 }
 0x160   :  { %v1682_v56 = vpop.f32.mrf.mxu3  ;;  %v1710_v6 = vpop.f32.mrf.mxu0  ;;  %2386 = vmatpush.bf16.msra.mxu3 %v3839_v29 }
 0x161   :  { %2223 = vmatmul.bf16.vlgmr.msrb.gmra.mxu2 %v1739_v34  ;;  %v1670_v51 = vpop.f32.mrf.mxu1  ;;  %v1683_v11 = vadd.f32 %v1682_v56, %v1669_v9  ;;  %v3849_v34 = vld [vmem:[#allocation10 + $0x60] sm:$0xff] }
 0x162   :  { %v1671_v12 = vadd.f32 %v1670_v51, %v1657_v7  ;;  %2398 = vmatpush.bf16.msra.mxu1 %v3849_v34 }
 0x164   :  { %v1696_v52 = vpop.f32.mrf.mxu2  ;;  %2387 = vmatpush.bf16.msra.mxu3 %v3838_v31 }
 0x165   :  { %v1697_v42 = vadd.f32 %v1696_v52, %v1683_v11 }
 0x166   :  { %2399 = vmatpush.bf16.msra.mxu1 %v3848_v35 }
 0x167   :  { %v1711_v44 = vadd.f32 %v1710_v6, %v1697_v42 }
 0x168   :  { %v1684_v10 = vpop.f32.mrf.mxu3  ;;  %v1712_v16 = vpop.f32.mrf.mxu0  ;;  %2388 = vmatpush.bf16.msra.mxu3 %v3837_v33 }
 0x169   :  { %v1685_v13 = vadd.f32 %v1684_v10, %v1671_v12 }
 0x16a   :  { %2400 = vmatpush.bf16.msra.mxu1 %v3847_v36 }
 0x16c   :  { %v1698_v3 = vpop.f32.mrf.mxu2 }
 0x16d   :  { %v1699_v15 = vadd.f32 %v1698_v3, %v1685_v13 }
 0x16e   :  { %2401 = vmatpush.bf16.msra.mxu1 %v3846_v8 }
 0x16f   :  { %v1713_v17 = vadd.f32 %v1712_v16, %v1699_v15 }
 0x172   :  { %2402 = vmatpush.bf16.msra.mxu1 %v3845_v41 }
 0x174   :  { %v1724_v14 = vpop.f32.mrf.mxu2 }
 0x175   :  { %v1725_v18 = vadd.f32 %v1724_v14, %v1711_v44 }
 0x177   :  { %v1732_v20 = vmax.f32 %v1725_v18, 0.0 }
 0x17c   :  { %v1726_v19 = vpop.f32.mrf.mxu2 }
 0x17d   :  { %v1727_v55 = vadd.f32 %v1726_v19, %v1713_v17  ;;  %v3872_v19 = vld [vmem:[%s4174_s6] ss:$0 sm:$0xff] }
 0x17f   :  { %v1736_v21 = vmax.f32 %v1727_v55, 0.0 }
 0x180   :  { %v2140_v38 = vpop.f32.mrf.mxu3 }
 0x181   :  { %v1740_v22 = vpack.c.bf16 %v1736_v21, %v1732_v20  ;;  %v2141_v48 = vadd.f32 %v2140_v38, %v1807_v43 }
 0x183   :  { %2181 = vmatmul.bf16.vlgmr.msra.gmra.mxu0 %v1740_v22 }
 0x188   :  { %v2142_v45 = vpop.f32.mrf.mxu3 }
 0x189   :  { %v2143_v49 = vadd.f32 %v2142_v45, %v1807_v43 }
 0x193   :  { %2237 = vmatmul.bf16.vlgmr.msrb.gmra.mxu0 %v1740_v22 }
 0x194   :  { %v2154_v39 = vpop.f32.mrf.mxu1 }
 0x195   :  { %v2155_v52 = vadd.f32 %v2154_v39, %v2141_v48 }
 0x19c   :  { %v2156_v54 = vpop.f32.mrf.mxu1 }
 0x19d   :  { %v2157_v60 = vadd.f32 %v2156_v54, %v2143_v49 }
 0x1a0   :  { %v2196_v56 = vpop.f32.mrf.mxu3 }
 0x1a1   :  { %v2197_v5 = vadd.f32 %v2196_v56, %v1808_v1 }
 0x1a4   :  { %v2210_v59 = vpop.f32.mrf.mxu1 }
 0x1a5   :  { %v2211_v7 = vadd.f32 %v2210_v59, %v2197_v5 }
 0x1a8   :  { %v2198_v3 = vpop.f32.mrf.mxu3 }
 0x1a9   :  { %v2199_v6 = vadd.f32 %v2198_v3, %v1808_v1 }
 0x1ac   :  { %v2212_v51 = vpop.f32.mrf.mxu1 }
 0x1ad   :  { %v2213_v10 = vadd.f32 %v2212_v51, %v2199_v6 }
 0x1d4   :  { %v2168_v50 = vpop.f32.mrf.mxu2 }
 0x1d5   :  { %v2169_v53 = vadd.f32 %v2168_v50, %v2155_v52 }
 0x1dc   :  { %v2170_v46 = vpop.f32.mrf.mxu2 }
 0x1dd   :  { %v2171_v57 = vadd.f32 %v2170_v46, %v2157_v60 }
 0x1e4   :  { %v2224_v37 = vpop.f32.mrf.mxu2 }
 0x1e5   :  { %v2225_v11 = vadd.f32 %v2224_v37, %v2211_v7 }
 0x1ec   :  { %v2226_v9 = vpop.f32.mrf.mxu2 }
 0x1ed   :  { %v2227_v12 = vadd.f32 %v2226_v9, %v2213_v10 }
 0x200   :  { %v2182_v47 = vpop.f32.mrf.mxu0 }
 0x201   :  { %v2183_v58 = vadd.f32 %v2182_v47, %v2169_v53 }
 0x203   :  { %v2243_v63 = vmax.f32 %v2183_v58, 0.0 }
 0x208   :  { %v2184_v61 = vpop.f32.mrf.mxu0 }
 0x209   :  { %v2185_v62 = vadd.f32 %v2184_v61, %v2171_v57 }
 0x20b   :  { %v2245_v0 = vmax.f32 %v2185_v62, 0.0 }
 0x20d   :  { %v2247_v2 = vpack.c.bf16 %v2245_v0, %v2243_v63 }
 0x20f   :  { %2389 = vmatmul.bf16.vlgmr.msra.gmra.mxu3 %v2247_v2 }
 0x210   :  { %v2238_v4 = vpop.f32.mrf.mxu0 }
 0x211   :  { %v2239_v13 = vadd.f32 %v2238_v4, %v2225_v11 }
 0x213   :  { %v2244_v15 = vmax.f32 %v2239_v13, 0.0 }
 0x218   :  { %v2240_v14 = vpop.f32.mrf.mxu0 }
 0x219   :  { %v2241_v42 = vadd.f32 %v2240_v14, %v2227_v12 }
 0x21b   :  { %v2246_v16 = vmax.f32 %v2241_v42, 0.0 }
 0x21d   :  { %v2248_v44 = vpack.c.bf16 %v2246_v16, %v2244_v15 }
 0x21f   :  { %2403 = vmatmul.bf16.vlgmr.msra.gmra.mxu1 %v2248_v44 }
 0x292   :  { %v2390_v17 = vpop.f32.mrf.mxu3 }
 0x293   :  { %v2391_v20 = vadd.f32 %v3872_v19, %v2390_v17 }
 0x29a   :  { %v2392_v55 = vpop.f32.mrf.mxu3 }
 0x29b   :  { %v2393_v21 = vadd.f32 %v3872_v19, %v2392_v55 }
 0x29c   :  { %v2404_v18 = vpop.f32.mrf.mxu1 }
 0x29d   :  { %v2405_v23 = vadd.f32 %v2404_v18, %v2391_v20 }
 0x2a4   :  { %v2406_v22 = vpop.f32.mrf.mxu1 }
 0x2a5   :  { %v2407_v24 = vadd.f32 %v2406_v22, %v2393_v21 }
 0x2a7   :  { %v3856_v25 = vpack.c.bf16 %v2407_v24, %v2405_v23 }
 0x2a9   :  { %3857 = vst [vmem:[#allocation11] sm:$0xff] %v3856_v25  }
 0x2aa   :  { %2425 = dma.vmem_to_hbm [thread:$0]  %s2418_s10, 128, %s2420_s13, [#allocation4], %s4036_s29, %s4036_s29, %s4037_s30  }
 0x2ab   :  { %4023 = dma.done.wait [#allocation4], 128  }
 0x2ac   :  { %4024 = vsyncadd [#allocation4], 4294967168 }
 0x2ad   :  { %2430 = vsyncpa [#allocation3], 1 }
 0x2ae   :  { %2431 = vsyncpa [#allocation6], 1 }
 0x2af   :  { %2432 = vsyncpa [#allocation9], 1 }
 0x2b0   :  { %2433 = vsyncpa [#allocation4], 1 }

</bundles_post_ra>
